<compile_context>
chip_gen: v5e
topology: v5e:2x2
jax: 0.10.0
libtpu: 0.0.40
codegen_flags: <defaults>
</compile_context>

<pallas_src>
import functools
import math

import jax
import jax.numpy as jnp
from jax.experimental import pallas as pl
from jax.experimental.pallas import tpu as pltpu


# ----------------------------------------------------------------------------
# Fused kernel: one (batch-group g, layer l) grid step == one full encoder block
# applied to Bt lane-packed batch elements.
# ----------------------------------------------------------------------------
def _encoder_kernel(x_ref, w_ref, c_ref, n_ref,           # inputs
                    out_ref, attn_ref,                     # outputs
                    tmp_ref,                               # scratch (H, Bt*W) f32
                    *, H, W, Bt, Kp, dil_p, pad_p, Kd, dil_d, pad_d):
    layer = pl.program_id(1)
    BtW = Bt * W
    inv_n = 1.0 / float(H * W)
    pow2 = (W & (W - 1)) == 0

    # Layer 0: seed the resident state (out block index is constant along the
    # layer axis, so out_ref stays in VMEM across all layers of this group).
    @pl.when(layer == 0)
    def _():
        out_ref[0] = x_ref[0]

    x = out_ref[0]                                         # (H, BtW) f32 resident state

    # Lane-position helpers (static pattern; computed once per grid step, cheap VPU work).
    lane = jax.lax.broadcasted_iota(jnp.int32, (H, BtW), 1)
    lig = (lane & (W - 1)) if pow2 else (lane % W)         # lane index within its batch group
    rr = jax.lax.broadcasted_iota(jnp.int32, (BtW, BtW), 0)
    cc = jax.lax.broadcasted_iota(jnp.int32, (BtW, BtW), 1)
    if pow2:
        P = ((rr - (rr & (W - 1))) == (cc - (cc & (W - 1)))).astype(jnp.float32)
    else:
        P = ((rr - rr % W) == (cc - cc % W)).astype(jnp.float32)
    # P[j', j] = 1 iff lanes j', j belong to the same batch group (group-sum broadcast).

    def layernorm(v, g2, b2):
        # torch.nn.LayerNorm([H, W]) per batch element; two-pass (centered) variance.
        mean = jnp.sum(jnp.dot(v, P, preferred_element_type=jnp.float32),
                       axis=0, keepdims=True) * inv_n       # (1, BtW), constant per group
        cen = v - mean
        var = jnp.sum(jnp.dot(cen * cen, P, preferred_element_type=jnp.float32),
                      axis=0, keepdims=True) * inv_n
        return cen * jax.lax.rsqrt(var + 1e-5) * g2 + b2

    def shifted(v, s):
        # u[:, j] = v[:, j + s] within each W-lane batch group, 0 outside the group.
        if s == 0:
            return v
        if s > 0:
            tmp_ref[:, 0:BtW - s] = v[:, s:BtW]
        else:
            tmp_ref[:, -s:BtW] = v[:, 0:BtW + s]
        # Unwritten / cross-group lanes are exactly the masked-out ones.
        return jnp.where((lig + s >= 0) & (lig + s < W), tmp_ref[...], 0.0)

    def conv1d(v, w_slot, b_slot, K, dil, pad):
        # 'same' Conv1d (stride 1) as K accumulating MXU matmuls (bf16 operands, f32 acc).
        acc = jnp.zeros((H, BtW), jnp.float32)
        for k in range(K):
            s = k * dil - pad
            xs = shifted(v, s).astype(jnp.bfloat16)
            wk = w_ref[0, w_slot, :, k * H:(k + 1) * H]      # (H, H) bf16, tap k
            acc = acc + jnp.dot(wk, xs, preferred_element_type=jnp.float32)
        return acc + c_ref[0, b_slot]                        # bias (H,1) broadcasts over lanes

    # --- diag-projected scaled dot-product attention + AddNorm --------------------------
    qd = c_ref[0, 0]                                         # (H, 1); 1/sqrt(W) pre-folded
    kd = c_ref[0, 1]
    vd = c_ref[0, 2]
    for b in range(Bt):                                      # per original batch element
        xb = x[:, b * W:(b + 1) * W]                         # (H, W) static lane slice
        sc = jax.lax.dot_general(qd * xb, kd * xb, (((1,), (1,)), ((), ())),
                                 preferred_element_type=jnp.float32)   # (H, H)
        e = jnp.exp(sc - jnp.max(sc, axis=-1, keepdims=True))
        a = e / jnp.sum(e, axis=-1, keepdims=True)           # exact softmax normalisation
        tmp_ref[:, b * W:(b + 1) * W] = jnp.dot(a, vd * xb,
                                                preferred_element_type=jnp.float32)
        attn_ref[b, layer] = a                               # resident across layers
    x = layernorm(tmp_ref[...] + x, n_ref[0, 0], n_ref[0, 1])

    # --- pcnn1 / pcnn2, each followed by AddNorm ----------------------------------------
    x = layernorm(conv1d(x, 0, 3, Kp, dil_p, pad_p) + x, n_ref[0, 2], n_ref[0, 3])
    x = layernorm(conv1d(x, 1, 4, Kp, dil_p, pad_p) + x, n_ref[0, 4], n_ref[0, 5])

    # --- dccnn1 / dccnn2 (no residual, no norm) -----------------------------------------
    x = conv1d(x, 2, 5, Kd, dil_d, pad_d)
    x = conv1d(x, 3, 6, Kd, dil_d, pad_d)

    out_ref[0] = x


# ----------------------------------------------------------------------------
# Wrapper: single pallas_call for the whole Encoder (all layers, all batches).
# ----------------------------------------------------------------------------
def encoder_pallas(x, layer_params, cfg, block_batch=None):
    B, H, W = x.shape
    L = len(layer_params)
    Kp, dil_p, pad_p = cfg["pcnn_k"], cfg["pcnn_dil"], cfg["pcnn_pad"]
    Kd, dil_d, pad_d = cfg["dccnn_k"], cfg["dccnn_dil"], cfg["dccnn_pad"]
    assert cfg.get("pcnn_stride", 1) == 1 and cfg.get("dccnn_stride", 1) == 1
    assert 2 * pad_p == dil_p * (Kp - 1), "pcnn must be shape preserving"
    assert 2 * pad_d == dil_d * (Kd - 1), "dccnn must be shape preserving"

    # Lane-pack the batch: Bt elements per grid step so the resident state, conv matmul
    # N dim and HBM stores are >= 128 lanes wide (review item 1).
    Bt = block_batch if block_batch is not None else min(B, max(1, -(-128 // W)))
    while B % Bt:
        Bt -= 1
    G = B // Bt
    BtW = Bt * W
    Kmax = max(Kp, Kd)

    # (B, H, W) -> (G, H, Bt*W) with xp[g, h, b*W + w] = x[g*Bt + b, h, w].
    xp = x.reshape(G, Bt, H, W).transpose(0, 2, 1, 3).reshape(G, H, BtW)

    def fuse_w(w, K):   # Conv1d weight (Cout, Cin, K) -> (Cout, K*Cin), padded to Kmax*Cin
        wf = jnp.transpose(w, (0, 2, 1)).reshape(H, K * H)
        if K < Kmax:
            wf = jnp.pad(wf, ((0, 0), (0, (Kmax - K) * H)))
        return wf

    # Coalesced per-layer parameter slabs (review item 2): 3 streams instead of 18.
    w_slab = jnp.stack(
        [jnp.stack([fuse_w(p["wp1"], Kp), fuse_w(p["wp2"], Kp),
                    fuse_w(p["wd1"], Kd), fuse_w(p["wd2"], Kd)], 0)
         for p in layer_params], 0).astype(jnp.bfloat16)             # (L, 4, H, Kmax*H)

    c_slab = jnp.stack(
        [jnp.stack([jnp.diagonal(p["Wq"]) * (1.0 / math.sqrt(W)),
                    jnp.diagonal(p["Wk"]), jnp.diagonal(p["Wv"]),
                    p["bp1"], p["bp2"], p["bd1"], p["bd2"]], 0)
         for p in layer_params], 0)[..., None]                       # (L, 7, H, 1)

    tile = lambda a: jnp.tile(a, (1, Bt))                            # (H,W) -> (H, Bt*W)
    n_slab = jnp.stack(
        [jnp.stack([tile(p["ga"]), tile(p["bea"]),
                    tile(p["gp1"]), tile(p["bep1"]),
                    tile(p["gp2"]), tile(p["bep2"])], 0)
         for p in layer_params], 0)                                  # (L, 6, H, Bt*W)

    kernel = functools.partial(_encoder_kernel, H=H, W=W, Bt=Bt,
                               Kp=Kp, dil_p=dil_p, pad_p=pad_p,
                               Kd=Kd, dil_d=dil_d, pad_d=pad_d)

    in_specs = (
        pl.BlockSpec((1, H, BtW), lambda g, l: (g, 0, 0)),            # packed X (per group)
        pl.BlockSpec((1, 4, H, Kmax * H), lambda g, l: (l, 0, 0, 0)),  # conv weights
        pl.BlockSpec((1, 7, H, 1), lambda g, l: (l, 0, 0, 0)),         # diag(Wq/Wk/Wv)+biases
        pl.BlockSpec((1, 6, H, BtW), lambda g, l: (l, 0, 0, 0)),       # LN gamma/beta (tiled)
    )
    out_specs = (
        pl.BlockSpec((1, H, BtW), lambda g, l: (g, 0, 0)),             # X resident over layers
        pl.BlockSpec((Bt, L, H, H), lambda g, l: (g, 0, 0, 0)),        # attention, spans layers
    )
    out_shape = (jax.ShapeDtypeStruct((G, H, BtW), jnp.float32),
                 jax.ShapeDtypeStruct((B, L, H, H), jnp.float32))

    x_out, attn_all = pl.pallas_call(
        kernel,
        grid=(G, L),
        in_specs=in_specs,
        out_specs=out_specs,
        out_shape=out_shape,
        scratch_shapes=[pltpu.VMEM((H, BtW), jnp.float32)],            # shared shift/attn buffer
        compiler_params=pltpu.CompilerParams(
            dimension_semantics=("parallel", "arbitrary")),
    )(xp, w_slab, c_slab, n_slab)

    x_out = x_out.reshape(G, H, Bt, W).transpose(0, 2, 1, 3).reshape(B, H, W)
    return x_out, [attn_all[:, i] for i in range(L)]


# ----------------------------------------------------------------------------
# Pure-JAX reference (mirrors the PyTorch graph).  conv_dtype lets us also
# build a bf16-operand reference matching the kernel's MXU precision.
# ----------------------------------------------------------------------------
def _ref_conv1d(x, w, b, pad, dil, conv_dtype):
    K = w.shape[-1]
    Lin = x.shape[-1]
    Lout = Lin + 2 * pad - dil * (K - 1)
    xp = jnp.pad(x, ((0, 0), (0, 0), (pad, pad))).astype(conv_dtype)
    wc = w.astype(conv_dtype)
    acc = jnp.zeros((x.shape[0], w.shape[0], Lout), jnp.float32)
    for k in range(K):
        acc = acc + jnp.einsum("oi,bil->bol", wc[:, :, k],
                               xp[:, :, k * dil:k * dil + Lout],
                               preferred_element_type=jnp.float32)
    return acc + b[None, :, None]


def _ref_ln(x, g, b, eps=1e-5):
    m = jnp.mean(x, axis=(1, 2), keepdims=True)
    v = jnp.mean((x - m) ** 2, axis=(1, 2), keepdims=True)
    return (x - m) / jnp.sqrt(v + eps) * g[None] + b[None]


def _ref_block(x, p, cfg, conv_dtype):
    W = x.shape[-1]
    q = jnp.diagonal(p["Wq"])[None, :, None] * x
    k = jnp.diagonal(p["Wk"])[None, :, None] * x
    v = jnp.diagonal(p["Wv"])[None, :, None] * x
    scores = jnp.einsum("bhw,bgw->bhg", q, k,
                        preferred_element_type=jnp.float32) / math.sqrt(W)
    attn = jax.nn.softmax(scores, axis=-1)
    y = jnp.einsum("bhg,bgw->bhw", attn, v, preferred_element_type=jnp.float32)
    x = _ref_ln(y + x, p["ga"], p["bea"])
    y = _ref_conv1d(x, p["wp1"], p["bp1"], cfg["pcnn_pad"], cfg["pcnn_dil"], conv_dtype)
    x = _ref_ln(y + x, p["gp1"], p["bep1"])
    y = _ref_conv1d(x, p["wp2"], p["bp2"], cfg["pcnn_pad"], cfg["pcnn_dil"], conv_dtype)
    x = _ref_ln(y + x, p["gp2"], p["bep2"])
    x = _ref_conv1d(x, p["wd1"], p["bd1"], cfg["dccnn_pad"], cfg["dccnn_dil"], conv_dtype)
    x = _ref_conv1d(x, p["wd2"], p["bd2"], cfg["dccnn_pad"], cfg["dccnn_dil"], conv_dtype)
    return x, attn


def _ref_encoder(x, layer_params, cfg, conv_dtype=jnp.float32):
    attns = []
    for p in layer_params:
        x, a = _ref_block(x, p, cfg, conv_dtype)
        attns.append(a)
    return x, attns


# ----------------------------------------------------------------------------
def _init_layer_params(key, H, W, Kp, Kd):
    ks = jax.random.split(key, 17)
    n = lambda k, s, sc: jax.random.normal(k, s, jnp.float32) * sc
    g = lambda k: 1.0 + 0.1 * jax.random.normal(k, (H, W), jnp.float32)
    bt = lambda k: 0.1 * jax.random.normal(k, (H, W), jnp.float32)
    return dict(
        Wq=n(ks[0], (H, H), 0.5), Wk=n(ks[1], (H, H), 0.5), Wv=n(ks[2], (H, H), 0.5),
        ga=g(ks[3]), bea=bt(ks[4]),
        wp1=n(ks[5], (H, H, Kp), 0.15), bp1=n(ks[6], (H,), 0.1),
        gp1=g(ks[7]), bep1=bt(ks[8]),
        wp2=n(ks[9], (H, H, Kp), 0.15), bp2=n(ks[10], (H,), 0.1),
        gp2=g(ks[11]), bep2=bt(ks[12]),
        wd1=n(ks[13], (H, H, Kd), 0.15), bd1=n(ks[14], (H,), 0.1),
        wd2=n(ks[15], (H, H, Kd), 0.15), bd2=n(ks[16], (H,), 0.1),
    )


if __name__ == "__main__":
    # idim = (H, W) = (8, 16), batch = 16 (lane-packed into 2 groups of 8), 2 layers.
    B, H, W = 16, 8, 16
    n_layers = 2
    cfg = dict(dccnn_k=3, dccnn_stride=1, dccnn_pad=1, dccnn_dil=1,
               pcnn_k=3, pcnn_stride=1, pcnn_pad=1, pcnn_dil=1)

    root = jax.random.PRNGKey(0)
    kx, *lkeys = jax.random.split(root, n_layers + 1)
    x = jax.random.normal(kx, (B, H, W), jnp.float32)
    layer_params = [_init_layer_params(k, H, W, cfg["pcnn_k"], cfg["dccnn_k"])
                    for k in lkeys]

    out, attns = encoder_pallas(x, layer_params, cfg)
    out = jax.block_until_ready(out)
    attns = [jax.block_until_ready(a) for a in attns]

    # 1) tight check vs. a JAX reference that also uses bf16 conv operands (matches MXU).
    ref_bf, attn_bf = _ref_encoder(x, layer_params, cfg, conv_dtype=jnp.bfloat16)
    d_out = float(jnp.max(jnp.abs(out - ref_bf)))
    d_att = max(float(jnp.max(jnp.abs(a - r))) for a, r in zip(attns, attn_bf))
    assert d_out < 3e-2 and d_att < 2e-2, ("bf16-ref mismatch", d_out, d_att)

    # 2) sanity check vs. the pure-f32 reference of the PyTorch graph.
    ref_f32, attn_f32 = _ref_encoder(x, layer_params, cfg, conv_dtype=jnp.float32)
    d_out32 = float(jnp.max(jnp.abs(out - ref_f32)))
    d_att32 = max(float(jnp.max(jnp.abs(a - r))) for a, r in zip(attns, attn_f32))
    assert d_out32 < 1e-1 and d_att32 < 5e-2, ("f32-ref mismatch", d_out32, d_att32)

    print("KERNEL_OK")
</pallas_src>

<mosaic_0001>
module attributes {stable_mosaic.version = 11 : i64} {
  func.func @_encoder_kernel(%arg0: i32, %arg1: i32, %arg2: memref<1x8x128xf32, #tpu.memory_space<vmem>>, %arg3: memref<1x4x8x24xbf16, #tpu.memory_space<vmem>>, %arg4: memref<1x7x8x1xf32, #tpu.memory_space<vmem>>, %arg5: memref<1x6x8x128xf32, #tpu.memory_space<vmem>>, %arg6: memref<1x8x128xf32, #tpu.memory_space<vmem>>, %arg7: memref<8x2x8x8xf32, #tpu.memory_space<vmem>>, %arg8: memref<8x128xf32, #tpu.memory_space<vmem>>) attributes {dimension_semantics = [#tpu.dimension_semantics<parallel>, #tpu.dimension_semantics<arbitrary>], iteration_bounds = array<i64: 2, 2>, scalar_prefetch = 0 : i64, scratch_operands = 1 : i64, tpu.core_type = #tpu.core_type<tc>, window_params = [{transform_indices = @transform_0, window_bounds = array<i64: 1, 8, 128>}, {transform_indices = @transform_1, window_bounds = array<i64: 1, 4, 8, 24>}, {transform_indices = @transform_2, window_bounds = array<i64: 1, 7, 8, 1>}, {transform_indices = @transform_3, window_bounds = array<i64: 1, 6, 8, 128>}, {transform_indices = @transform_4, window_bounds = array<i64: 1, 8, 128>}, {transform_indices = @transform_5, window_bounds = array<i64: 8, 2, 8, 8>}]} {
    %c0_i32 = arith.constant 0 : i32
    %0 = arith.cmpi eq, %arg1, %c0_i32 : i32
    %1 = arith.extui %0 : i1 to i32
    %c0_i32_0 = arith.constant 0 : i32
    %2 = arith.cmpi ne, %1, %c0_i32_0 : i32
    scf.if %2 {
      %c0_272 = arith.constant 0 : index
      %c0_273 = arith.constant 0 : index
      %c0_274 = arith.constant 0 : index
      %480 = vector.load %arg2[%c0_272, %c0_273, %c0_274] : memref<1x8x128xf32, #tpu.memory_space<vmem>>, vector<1x8x128xf32>
      %481 = vector.shape_cast %480 : vector<1x8x128xf32> to vector<8x128xf32>
      %c0_275 = arith.constant 0 : index
      %c0_276 = arith.constant 0 : index
      %c0_277 = arith.constant 0 : index
      %482 = vector.load %arg6[%c0_275, %c0_276, %c0_277] : memref<1x8x128xf32, #tpu.memory_space<vmem>>, vector<1x8x128xf32>
      %483 = vector.shape_cast %482 : vector<1x8x128xf32> to vector<8x128xf32>
      %484 = vector.shape_cast %481 : vector<8x128xf32> to vector<1x8x128xf32>
      tpu.vector_store %arg6[%c0_275, %c0_276, %c0_277], %484 {strides = array<i32>} : memref<1x8x128xf32, #tpu.memory_space<vmem>>, vector<1x8x128xf32>,
    } else {
    }
    %c0 = arith.constant 0 : index
    %c0_1 = arith.constant 0 : index
    %c0_2 = arith.constant 0 : index
    %3 = vector.load %arg6[%c0, %c0_1, %c0_2] : memref<1x8x128xf32, #tpu.memory_space<vmem>>, vector<1x8x128xf32>
    %4 = vector.shape_cast %3 : vector<1x8x128xf32> to vector<8x128xf32>
    %5 = tpu.iota {dimensions = array<i32: 1>} : vector<8x128xi32>
    %c15_i32 = arith.constant 15 : i32
    %6 = vector.broadcast %c15_i32 : i32 to vector<8x128xi32>
    %7 = arith.andi %5, %6 : vector<8x128xi32>
    %8 = tpu.iota {dimensions = array<i32: 0>} : vector<128x128xi32>
    %9 = tpu.iota {dimensions = array<i32: 1>} : vector<128x128xi32>
    %c15_i32_3 = arith.constant 15 : i32
    %10 = vector.broadcast %c15_i32_3 : i32 to vector<128x128xi32>
    %11 = arith.andi %8, %10 : vector<128x128xi32>
    %12 = arith.subi %8, %11 : vector<128x128xi32>
    %c15_i32_4 = arith.constant 15 : i32
    %13 = vector.broadcast %c15_i32_4 : i32 to vector<128x128xi32>
    %14 = arith.andi %9, %13 : vector<128x128xi32>
    %15 = arith.subi %9, %14 : vector<128x128xi32>
    %16 = arith.cmpi eq, %12, %15 : vector<128x128xi32>
    %17 = arith.extui %16 : vector<128x128xi1> to vector<128x128xi32>
    %18 = arith.sitofp %17 : vector<128x128xi32> to vector<128x128xf32>
    %c0_5 = arith.constant 0 : index
    %c0_6 = arith.constant 0 : index
    %c0_7 = arith.constant 0 : index
    %c0_8 = arith.constant 0 : index
    %19 = vector.load %arg4[%c0_5, %c0_6, %c0_7, %c0_8] : memref<1x7x8x1xf32, #tpu.memory_space<vmem>>, vector<1x1x8x1xf32>
    %20 = vector.shape_cast %19 : vector<1x1x8x1xf32> to vector<8x1xf32>
    %c0_9 = arith.constant 0 : index
    %c1 = arith.constant 1 : index
    %c0_10 = arith.constant 0 : index
    %c0_11 = arith.constant 0 : index
    %21 = vector.load %arg4[%c0_9, %c1, %c0_10, %c0_11] : memref<1x7x8x1xf32, #tpu.memory_space<vmem>>, vector<1x1x8x1xf32>
    %22 = vector.shape_cast %21 : vector<1x1x8x1xf32> to vector<8x1xf32>
    %c0_12 = arith.constant 0 : index
    %c2 = arith.constant 2 : index
    %c0_13 = arith.constant 0 : index
    %c0_14 = arith.constant 0 : index
    %23 = vector.load %arg4[%c0_12, %c2, %c0_13, %c0_14] : memref<1x7x8x1xf32, #tpu.memory_space<vmem>>, vector<1x1x8x1xf32>
    %24 = vector.shape_cast %23 : vector<1x1x8x1xf32> to vector<8x1xf32>
    %25 = vector.extract_strided_slice %4 {offsets = [0, 0], sizes = [8, 16], strides = [1, 1]} : vector<8x128xf32> to vector<8x16xf32>
    %26 = vector.broadcast %20 : vector<8x1xf32> to vector<8x16xf32>
    %27 = arith.mulf %26, %25 : vector<8x16xf32>
    %28 = vector.broadcast %22 : vector<8x1xf32> to vector<8x16xf32>
    %29 = arith.mulf %28, %25 : vector<8x16xf32>
    %cst = arith.constant dense<0.000000e+00> : vector<8x8xf32>
    %30 = tpu.matmul %27, %29, %cst {dimension_numbers = #tpu.dot_dimension_numbers<[1], [1], [0], [0], [0, 0, 1, 0], [], []>} : vector<8x16xf32>, vector<8x16xf32>, vector<8x8xf32> -> vector<8x8xf32>
    %cst_15 = arith.constant dense<0xFF800000> : vector<8xf32>
    %31 = vector.multi_reduction <maximumf>, %30, %cst_15 [1] : vector<8x8xf32> to vector<8xf32>
    %32 = vector.shape_cast %31 : vector<8xf32> to vector<8x1xf32>
    %33 = vector.broadcast %32 : vector<8x1xf32> to vector<8x8xf32>
    %34 = arith.subf %30, %33 : vector<8x8xf32>
    %35 = math.exp %34 : vector<8x8xf32>
    %cst_16 = arith.constant dense<0.000000e+00> : vector<8xf32>
    %36 = vector.multi_reduction <add>, %35, %cst_16 [1] : vector<8x8xf32> to vector<8xf32>
    %37 = vector.shape_cast %36 : vector<8xf32> to vector<8x1xf32>
    %38 = vector.broadcast %37 : vector<8x1xf32> to vector<8x8xf32>
    %39 = arith.divf %35, %38 : vector<8x8xf32>
    %40 = vector.broadcast %24 : vector<8x1xf32> to vector<8x16xf32>
    %41 = arith.mulf %40, %25 : vector<8x16xf32>
    %cst_17 = arith.constant dense<0.000000e+00> : vector<8x16xf32>
    %42 = tpu.matmul %39, %41, %cst_17 {dimension_numbers = #tpu.dot_dimension_numbers<[1], [0], [0], [1], [0, 0, 1, 1], [], []>} : vector<8x8xf32>, vector<8x16xf32>, vector<8x16xf32> -> vector<8x16xf32>
    %c0_18 = arith.constant 0 : index
    %c0_19 = arith.constant 0 : index
    %43 = vector.load %arg8[%c0_18, %c0_19] : memref<8x128xf32, #tpu.memory_space<vmem>>, vector<8x16xf32>
    tpu.vector_store %arg8[%c0_18, %c0_19], %42 {strides = array<i32>} : memref<8x128xf32, #tpu.memory_space<vmem>>, vector<8x16xf32>,
    %c0_20 = arith.constant 0 : index
    %44 = arith.index_cast %arg1 : i32 to index
    %c0_21 = arith.constant 0 : index
    %c0_22 = arith.constant 0 : index
    %45 = vector.load %arg7[%c0_20, %44, %c0_21, %c0_22] : memref<8x2x8x8xf32, #tpu.memory_space<vmem>>, vector<1x1x8x8xf32>
    %46 = vector.shape_cast %45 : vector<1x1x8x8xf32> to vector<8x8xf32>
    %47 = vector.shape_cast %39 : vector<8x8xf32> to vector<1x1x8x8xf32>
    tpu.vector_store %arg7[%c0_20, %44, %c0_21, %c0_22], %47 {strides = array<i32>} : memref<8x2x8x8xf32, #tpu.memory_space<vmem>>, vector<1x1x8x8xf32>,
    %48 = vector.extract_strided_slice %4 {offsets = [0, 16], sizes = [8, 16], strides = [1, 1]} : vector<8x128xf32> to vector<8x16xf32>
    %49 = vector.broadcast %20 : vector<8x1xf32> to vector<8x16xf32>
    %50 = arith.mulf %49, %48 : vector<8x16xf32>
    %51 = vector.broadcast %22 : vector<8x1xf32> to vector<8x16xf32>
    %52 = arith.mulf %51, %48 : vector<8x16xf32>
    %cst_23 = arith.constant dense<0.000000e+00> : vector<8x8xf32>
    %53 = tpu.matmul %50, %52, %cst_23 {dimension_numbers = #tpu.dot_dimension_numbers<[1], [1], [0], [0], [0, 0, 1, 0], [], []>} : vector<8x16xf32>, vector<8x16xf32>, vector<8x8xf32> -> vector<8x8xf32>
    %cst_24 = arith.constant dense<0xFF800000> : vector<8xf32>
    %54 = vector.multi_reduction <maximumf>, %53, %cst_24 [1] : vector<8x8xf32> to vector<8xf32>
    %55 = vector.shape_cast %54 : vector<8xf32> to vector<8x1xf32>
    %56 = vector.broadcast %55 : vector<8x1xf32> to vector<8x8xf32>
    %57 = arith.subf %53, %56 : vector<8x8xf32>
    %58 = math.exp %57 : vector<8x8xf32>
    %cst_25 = arith.constant dense<0.000000e+00> : vector<8xf32>
    %59 = vector.multi_reduction <add>, %58, %cst_25 [1] : vector<8x8xf32> to vector<8xf32>
    %60 = vector.shape_cast %59 : vector<8xf32> to vector<8x1xf32>
    %61 = vector.broadcast %60 : vector<8x1xf32> to vector<8x8xf32>
    %62 = arith.divf %58, %61 : vector<8x8xf32>
    %63 = vector.broadcast %24 : vector<8x1xf32> to vector<8x16xf32>
    %64 = arith.mulf %63, %48 : vector<8x16xf32>
    %cst_26 = arith.constant dense<0.000000e+00> : vector<8x16xf32>
    %65 = tpu.matmul %62, %64, %cst_26 {dimension_numbers = #tpu.dot_dimension_numbers<[1], [0], [0], [1], [0, 0, 1, 1], [], []>} : vector<8x8xf32>, vector<8x16xf32>, vector<8x16xf32> -> vector<8x16xf32>
    %c0_27 = arith.constant 0 : index
    %c16 = arith.constant 16 : index
    %66 = vector.load %arg8[%c0_27, %c16] : memref<8x128xf32, #tpu.memory_space<vmem>>, vector<8x16xf32>
    tpu.vector_store %arg8[%c0_27, %c16], %65 {strides = array<i32>} : memref<8x128xf32, #tpu.memory_space<vmem>>, vector<8x16xf32>,
    %c1_28 = arith.constant 1 : index
    %67 = arith.index_cast %arg1 : i32 to index
    %c0_29 = arith.constant 0 : index
    %c0_30 = arith.constant 0 : index
    %68 = vector.load %arg7[%c1_28, %67, %c0_29, %c0_30] : memref<8x2x8x8xf32, #tpu.memory_space<vmem>>, vector<1x1x8x8xf32>
    %69 = vector.shape_cast %68 : vector<1x1x8x8xf32> to vector<8x8xf32>
    %70 = vector.shape_cast %62 : vector<8x8xf32> to vector<1x1x8x8xf32>
    tpu.vector_store %arg7[%c1_28, %67, %c0_29, %c0_30], %70 {strides = array<i32>} : memref<8x2x8x8xf32, #tpu.memory_space<vmem>>, vector<1x1x8x8xf32>,
    %71 = vector.extract_strided_slice %4 {offsets = [0, 32], sizes = [8, 16], strides = [1, 1]} : vector<8x128xf32> to vector<8x16xf32>
    %72 = vector.broadcast %20 : vector<8x1xf32> to vector<8x16xf32>
    %73 = arith.mulf %72, %71 : vector<8x16xf32>
    %74 = vector.broadcast %22 : vector<8x1xf32> to vector<8x16xf32>
    %75 = arith.mulf %74, %71 : vector<8x16xf32>
    %cst_31 = arith.constant dense<0.000000e+00> : vector<8x8xf32>
    %76 = tpu.matmul %73, %75, %cst_31 {dimension_numbers = #tpu.dot_dimension_numbers<[1], [1], [0], [0], [0, 0, 1, 0], [], []>} : vector<8x16xf32>, vector<8x16xf32>, vector<8x8xf32> -> vector<8x8xf32>
    %cst_32 = arith.constant dense<0xFF800000> : vector<8xf32>
    %77 = vector.multi_reduction <maximumf>, %76, %cst_32 [1] : vector<8x8xf32> to vector<8xf32>
    %78 = vector.shape_cast %77 : vector<8xf32> to vector<8x1xf32>
    %79 = vector.broadcast %78 : vector<8x1xf32> to vector<8x8xf32>
    %80 = arith.subf %76, %79 : vector<8x8xf32>
    %81 = math.exp %80 : vector<8x8xf32>
    %cst_33 = arith.constant dense<0.000000e+00> : vector<8xf32>
    %82 = vector.multi_reduction <add>, %81, %cst_33 [1] : vector<8x8xf32> to vector<8xf32>
    %83 = vector.shape_cast %82 : vector<8xf32> to vector<8x1xf32>
    %84 = vector.broadcast %83 : vector<8x1xf32> to vector<8x8xf32>
    %85 = arith.divf %81, %84 : vector<8x8xf32>
    %86 = vector.broadcast %24 : vector<8x1xf32> to vector<8x16xf32>
    %87 = arith.mulf %86, %71 : vector<8x16xf32>
    %cst_34 = arith.constant dense<0.000000e+00> : vector<8x16xf32>
    %88 = tpu.matmul %85, %87, %cst_34 {dimension_numbers = #tpu.dot_dimension_numbers<[1], [0], [0], [1], [0, 0, 1, 1], [], []>} : vector<8x8xf32>, vector<8x16xf32>, vector<8x16xf32> -> vector<8x16xf32>
    %c0_35 = arith.constant 0 : index
    %c32 = arith.constant 32 : index
    %89 = vector.load %arg8[%c0_35, %c32] : memref<8x128xf32, #tpu.memory_space<vmem>>, vector<8x16xf32>
    tpu.vector_store %arg8[%c0_35, %c32], %88 {strides = array<i32>} : memref<8x128xf32, #tpu.memory_space<vmem>>, vector<8x16xf32>,
    %c2_36 = arith.constant 2 : index
    %90 = arith.index_cast %arg1 : i32 to index
    %c0_37 = arith.constant 0 : index
    %c0_38 = arith.constant 0 : index
    %91 = vector.load %arg7[%c2_36, %90, %c0_37, %c0_38] : memref<8x2x8x8xf32, #tpu.memory_space<vmem>>, vector<1x1x8x8xf32>
    %92 = vector.shape_cast %91 : vector<1x1x8x8xf32> to vector<8x8xf32>
    %93 = vector.shape_cast %85 : vector<8x8xf32> to vector<1x1x8x8xf32>
    tpu.vector_store %arg7[%c2_36, %90, %c0_37, %c0_38], %93 {strides = array<i32>} : memref<8x2x8x8xf32, #tpu.memory_space<vmem>>, vector<1x1x8x8xf32>,
    %94 = vector.extract_strided_slice %4 {offsets = [0, 48], sizes = [8, 16], strides = [1, 1]} : vector<8x128xf32> to vector<8x16xf32>
    %95 = vector.broadcast %20 : vector<8x1xf32> to vector<8x16xf32>
    %96 = arith.mulf %95, %94 : vector<8x16xf32>
    %97 = vector.broadcast %22 : vector<8x1xf32> to vector<8x16xf32>
    %98 = arith.mulf %97, %94 : vector<8x16xf32>
    %cst_39 = arith.constant dense<0.000000e+00> : vector<8x8xf32>
    %99 = tpu.matmul %96, %98, %cst_39 {dimension_numbers = #tpu.dot_dimension_numbers<[1], [1], [0], [0], [0, 0, 1, 0], [], []>} : vector<8x16xf32>, vector<8x16xf32>, vector<8x8xf32> -> vector<8x8xf32>
    %cst_40 = arith.constant dense<0xFF800000> : vector<8xf32>
    %100 = vector.multi_reduction <maximumf>, %99, %cst_40 [1] : vector<8x8xf32> to vector<8xf32>
    %101 = vector.shape_cast %100 : vector<8xf32> to vector<8x1xf32>
    %102 = vector.broadcast %101 : vector<8x1xf32> to vector<8x8xf32>
    %103 = arith.subf %99, %102 : vector<8x8xf32>
    %104 = math.exp %103 : vector<8x8xf32>
    %cst_41 = arith.constant dense<0.000000e+00> : vector<8xf32>
    %105 = vector.multi_reduction <add>, %104, %cst_41 [1] : vector<8x8xf32> to vector<8xf32>
    %106 = vector.shape_cast %105 : vector<8xf32> to vector<8x1xf32>
    %107 = vector.broadcast %106 : vector<8x1xf32> to vector<8x8xf32>
    %108 = arith.divf %104, %107 : vector<8x8xf32>
    %109 = vector.broadcast %24 : vector<8x1xf32> to vector<8x16xf32>
    %110 = arith.mulf %109, %94 : vector<8x16xf32>
    %cst_42 = arith.constant dense<0.000000e+00> : vector<8x16xf32>
    %111 = tpu.matmul %108, %110, %cst_42 {dimension_numbers = #tpu.dot_dimension_numbers<[1], [0], [0], [1], [0, 0, 1, 1], [], []>} : vector<8x8xf32>, vector<8x16xf32>, vector<8x16xf32> -> vector<8x16xf32>
    %c0_43 = arith.constant 0 : index
    %c48 = arith.constant 48 : index
    %112 = vector.load %arg8[%c0_43, %c48] : memref<8x128xf32, #tpu.memory_space<vmem>>, vector<8x16xf32>
    tpu.vector_store %arg8[%c0_43, %c48], %111 {strides = array<i32>} : memref<8x128xf32, #tpu.memory_space<vmem>>, vector<8x16xf32>,
    %c3 = arith.constant 3 : index
    %113 = arith.index_cast %arg1 : i32 to index
    %c0_44 = arith.constant 0 : index
    %c0_45 = arith.constant 0 : index
    %114 = vector.load %arg7[%c3, %113, %c0_44, %c0_45] : memref<8x2x8x8xf32, #tpu.memory_space<vmem>>, vector<1x1x8x8xf32>
    %115 = vector.shape_cast %114 : vector<1x1x8x8xf32> to vector<8x8xf32>
    %116 = vector.shape_cast %108 : vector<8x8xf32> to vector<1x1x8x8xf32>
    tpu.vector_store %arg7[%c3, %113, %c0_44, %c0_45], %116 {strides = array<i32>} : memref<8x2x8x8xf32, #tpu.memory_space<vmem>>, vector<1x1x8x8xf32>,
    %117 = vector.extract_strided_slice %4 {offsets = [0, 64], sizes = [8, 16], strides = [1, 1]} : vector<8x128xf32> to vector<8x16xf32>
    %118 = vector.broadcast %20 : vector<8x1xf32> to vector<8x16xf32>
    %119 = arith.mulf %118, %117 : vector<8x16xf32>
    %120 = vector.broadcast %22 : vector<8x1xf32> to vector<8x16xf32>
    %121 = arith.mulf %120, %117 : vector<8x16xf32>
    %cst_46 = arith.constant dense<0.000000e+00> : vector<8x8xf32>
    %122 = tpu.matmul %119, %121, %cst_46 {dimension_numbers = #tpu.dot_dimension_numbers<[1], [1], [0], [0], [0, 0, 1, 0], [], []>} : vector<8x16xf32>, vector<8x16xf32>, vector<8x8xf32> -> vector<8x8xf32>
    %cst_47 = arith.constant dense<0xFF800000> : vector<8xf32>
    %123 = vector.multi_reduction <maximumf>, %122, %cst_47 [1] : vector<8x8xf32> to vector<8xf32>
    %124 = vector.shape_cast %123 : vector<8xf32> to vector<8x1xf32>
    %125 = vector.broadcast %124 : vector<8x1xf32> to vector<8x8xf32>
    %126 = arith.subf %122, %125 : vector<8x8xf32>
    %127 = math.exp %126 : vector<8x8xf32>
    %cst_48 = arith.constant dense<0.000000e+00> : vector<8xf32>
    %128 = vector.multi_reduction <add>, %127, %cst_48 [1] : vector<8x8xf32> to vector<8xf32>
    %129 = vector.shape_cast %128 : vector<8xf32> to vector<8x1xf32>
    %130 = vector.broadcast %129 : vector<8x1xf32> to vector<8x8xf32>
    %131 = arith.divf %127, %130 : vector<8x8xf32>
    %132 = vector.broadcast %24 : vector<8x1xf32> to vector<8x16xf32>
    %133 = arith.mulf %132, %117 : vector<8x16xf32>
    %cst_49 = arith.constant dense<0.000000e+00> : vector<8x16xf32>
    %134 = tpu.matmul %131, %133, %cst_49 {dimension_numbers = #tpu.dot_dimension_numbers<[1], [0], [0], [1], [0, 0, 1, 1], [], []>} : vector<8x8xf32>, vector<8x16xf32>, vector<8x16xf32> -> vector<8x16xf32>
    %c0_50 = arith.constant 0 : index
    %c64 = arith.constant 64 : index
    %135 = vector.load %arg8[%c0_50, %c64] : memref<8x128xf32, #tpu.memory_space<vmem>>, vector<8x16xf32>
    tpu.vector_store %arg8[%c0_50, %c64], %134 {strides = array<i32>} : memref<8x128xf32, #tpu.memory_space<vmem>>, vector<8x16xf32>,
    %c4 = arith.constant 4 : index
    %136 = arith.index_cast %arg1 : i32 to index
    %c0_51 = arith.constant 0 : index
    %c0_52 = arith.constant 0 : index
    %137 = vector.load %arg7[%c4, %136, %c0_51, %c0_52] : memref<8x2x8x8xf32, #tpu.memory_space<vmem>>, vector<1x1x8x8xf32>
    %138 = vector.shape_cast %137 : vector<1x1x8x8xf32> to vector<8x8xf32>
    %139 = vector.shape_cast %131 : vector<8x8xf32> to vector<1x1x8x8xf32>
    tpu.vector_store %arg7[%c4, %136, %c0_51, %c0_52], %139 {strides = array<i32>} : memref<8x2x8x8xf32, #tpu.memory_space<vmem>>, vector<1x1x8x8xf32>,
    %140 = vector.extract_strided_slice %4 {offsets = [0, 80], sizes = [8, 16], strides = [1, 1]} : vector<8x128xf32> to vector<8x16xf32>
    %141 = vector.broadcast %20 : vector<8x1xf32> to vector<8x16xf32>
    %142 = arith.mulf %141, %140 : vector<8x16xf32>
    %143 = vector.broadcast %22 : vector<8x1xf32> to vector<8x16xf32>
    %144 = arith.mulf %143, %140 : vector<8x16xf32>
    %cst_53 = arith.constant dense<0.000000e+00> : vector<8x8xf32>
    %145 = tpu.matmul %142, %144, %cst_53 {dimension_numbers = #tpu.dot_dimension_numbers<[1], [1], [0], [0], [0, 0, 1, 0], [], []>} : vector<8x16xf32>, vector<8x16xf32>, vector<8x8xf32> -> vector<8x8xf32>
    %cst_54 = arith.constant dense<0xFF800000> : vector<8xf32>
    %146 = vector.multi_reduction <maximumf>, %145, %cst_54 [1] : vector<8x8xf32> to vector<8xf32>
    %147 = vector.shape_cast %146 : vector<8xf32> to vector<8x1xf32>
    %148 = vector.broadcast %147 : vector<8x1xf32> to vector<8x8xf32>
    %149 = arith.subf %145, %148 : vector<8x8xf32>
    %150 = math.exp %149 : vector<8x8xf32>
    %cst_55 = arith.constant dense<0.000000e+00> : vector<8xf32>
    %151 = vector.multi_reduction <add>, %150, %cst_55 [1] : vector<8x8xf32> to vector<8xf32>
    %152 = vector.shape_cast %151 : vector<8xf32> to vector<8x1xf32>
    %153 = vector.broadcast %152 : vector<8x1xf32> to vector<8x8xf32>
    %154 = arith.divf %150, %153 : vector<8x8xf32>
    %155 = vector.broadcast %24 : vector<8x1xf32> to vector<8x16xf32>
    %156 = arith.mulf %155, %140 : vector<8x16xf32>
    %cst_56 = arith.constant dense<0.000000e+00> : vector<8x16xf32>
    %157 = tpu.matmul %154, %156, %cst_56 {dimension_numbers = #tpu.dot_dimension_numbers<[1], [0], [0], [1], [0, 0, 1, 1], [], []>} : vector<8x8xf32>, vector<8x16xf32>, vector<8x16xf32> -> vector<8x16xf32>
    %c0_57 = arith.constant 0 : index
    %c80 = arith.constant 80 : index
    %158 = vector.load %arg8[%c0_57, %c80] : memref<8x128xf32, #tpu.memory_space<vmem>>, vector<8x16xf32>
    tpu.vector_store %arg8[%c0_57, %c80], %157 {strides = array<i32>} : memref<8x128xf32, #tpu.memory_space<vmem>>, vector<8x16xf32>,
    %c5 = arith.constant 5 : index
    %159 = arith.index_cast %arg1 : i32 to index
    %c0_58 = arith.constant 0 : index
    %c0_59 = arith.constant 0 : index
    %160 = vector.load %arg7[%c5, %159, %c0_58, %c0_59] : memref<8x2x8x8xf32, #tpu.memory_space<vmem>>, vector<1x1x8x8xf32>
    %161 = vector.shape_cast %160 : vector<1x1x8x8xf32> to vector<8x8xf32>
    %162 = vector.shape_cast %154 : vector<8x8xf32> to vector<1x1x8x8xf32>
    tpu.vector_store %arg7[%c5, %159, %c0_58, %c0_59], %162 {strides = array<i32>} : memref<8x2x8x8xf32, #tpu.memory_space<vmem>>, vector<1x1x8x8xf32>,
    %163 = vector.extract_strided_slice %4 {offsets = [0, 96], sizes = [8, 16], strides = [1, 1]} : vector<8x128xf32> to vector<8x16xf32>
    %164 = vector.broadcast %20 : vector<8x1xf32> to vector<8x16xf32>
    %165 = arith.mulf %164, %163 : vector<8x16xf32>
    %166 = vector.broadcast %22 : vector<8x1xf32> to vector<8x16xf32>
    %167 = arith.mulf %166, %163 : vector<8x16xf32>
    %cst_60 = arith.constant dense<0.000000e+00> : vector<8x8xf32>
    %168 = tpu.matmul %165, %167, %cst_60 {dimension_numbers = #tpu.dot_dimension_numbers<[1], [1], [0], [0], [0, 0, 1, 0], [], []>} : vector<8x16xf32>, vector<8x16xf32>, vector<8x8xf32> -> vector<8x8xf32>
    %cst_61 = arith.constant dense<0xFF800000> : vector<8xf32>
    %169 = vector.multi_reduction <maximumf>, %168, %cst_61 [1] : vector<8x8xf32> to vector<8xf32>
    %170 = vector.shape_cast %169 : vector<8xf32> to vector<8x1xf32>
    %171 = vector.broadcast %170 : vector<8x1xf32> to vector<8x8xf32>
    %172 = arith.subf %168, %171 : vector<8x8xf32>
    %173 = math.exp %172 : vector<8x8xf32>
    %cst_62 = arith.constant dense<0.000000e+00> : vector<8xf32>
    %174 = vector.multi_reduction <add>, %173, %cst_62 [1] : vector<8x8xf32> to vector<8xf32>
    %175 = vector.shape_cast %174 : vector<8xf32> to vector<8x1xf32>
    %176 = vector.broadcast %175 : vector<8x1xf32> to vector<8x8xf32>
    %177 = arith.divf %173, %176 : vector<8x8xf32>
    %178 = vector.broadcast %24 : vector<8x1xf32> to vector<8x16xf32>
    %179 = arith.mulf %178, %163 : vector<8x16xf32>
    %cst_63 = arith.constant dense<0.000000e+00> : vector<8x16xf32>
    %180 = tpu.matmul %177, %179, %cst_63 {dimension_numbers = #tpu.dot_dimension_numbers<[1], [0], [0], [1], [0, 0, 1, 1], [], []>} : vector<8x8xf32>, vector<8x16xf32>, vector<8x16xf32> -> vector<8x16xf32>
    %c0_64 = arith.constant 0 : index
    %c96 = arith.constant 96 : index
    %181 = vector.load %arg8[%c0_64, %c96] : memref<8x128xf32, #tpu.memory_space<vmem>>, vector<8x16xf32>
    tpu.vector_store %arg8[%c0_64, %c96], %180 {strides = array<i32>} : memref<8x128xf32, #tpu.memory_space<vmem>>, vector<8x16xf32>,
    %c6 = arith.constant 6 : index
    %182 = arith.index_cast %arg1 : i32 to index
    %c0_65 = arith.constant 0 : index
    %c0_66 = arith.constant 0 : index
    %183 = vector.load %arg7[%c6, %182, %c0_65, %c0_66] : memref<8x2x8x8xf32, #tpu.memory_space<vmem>>, vector<1x1x8x8xf32>
    %184 = vector.shape_cast %183 : vector<1x1x8x8xf32> to vector<8x8xf32>
    %185 = vector.shape_cast %177 : vector<8x8xf32> to vector<1x1x8x8xf32>
    tpu.vector_store %arg7[%c6, %182, %c0_65, %c0_66], %185 {strides = array<i32>} : memref<8x2x8x8xf32, #tpu.memory_space<vmem>>, vector<1x1x8x8xf32>,
    %186 = vector.extract_strided_slice %4 {offsets = [0, 112], sizes = [8, 16], strides = [1, 1]} : vector<8x128xf32> to vector<8x16xf32>
    %187 = vector.broadcast %20 : vector<8x1xf32> to vector<8x16xf32>
    %188 = arith.mulf %187, %186 : vector<8x16xf32>
    %189 = vector.broadcast %22 : vector<8x1xf32> to vector<8x16xf32>
    %190 = arith.mulf %189, %186 : vector<8x16xf32>
    %cst_67 = arith.constant dense<0.000000e+00> : vector<8x8xf32>
    %191 = tpu.matmul %188, %190, %cst_67 {dimension_numbers = #tpu.dot_dimension_numbers<[1], [1], [0], [0], [0, 0, 1, 0], [], []>} : vector<8x16xf32>, vector<8x16xf32>, vector<8x8xf32> -> vector<8x8xf32>
    %cst_68 = arith.constant dense<0xFF800000> : vector<8xf32>
    %192 = vector.multi_reduction <maximumf>, %191, %cst_68 [1] : vector<8x8xf32> to vector<8xf32>
    %193 = vector.shape_cast %192 : vector<8xf32> to vector<8x1xf32>
    %194 = vector.broadcast %193 : vector<8x1xf32> to vector<8x8xf32>
    %195 = arith.subf %191, %194 : vector<8x8xf32>
    %196 = math.exp %195 : vector<8x8xf32>
    %cst_69 = arith.constant dense<0.000000e+00> : vector<8xf32>
    %197 = vector.multi_reduction <add>, %196, %cst_69 [1] : vector<8x8xf32> to vector<8xf32>
    %198 = vector.shape_cast %197 : vector<8xf32> to vector<8x1xf32>
    %199 = vector.broadcast %198 : vector<8x1xf32> to vector<8x8xf32>
    %200 = arith.divf %196, %199 : vector<8x8xf32>
    %201 = vector.broadcast %24 : vector<8x1xf32> to vector<8x16xf32>
    %202 = arith.mulf %201, %186 : vector<8x16xf32>
    %cst_70 = arith.constant dense<0.000000e+00> : vector<8x16xf32>
    %203 = tpu.matmul %200, %202, %cst_70 {dimension_numbers = #tpu.dot_dimension_numbers<[1], [0], [0], [1], [0, 0, 1, 1], [], []>} : vector<8x8xf32>, vector<8x16xf32>, vector<8x16xf32> -> vector<8x16xf32>
    %c0_71 = arith.constant 0 : index
    %c112 = arith.constant 112 : index
    %204 = vector.load %arg8[%c0_71, %c112] : memref<8x128xf32, #tpu.memory_space<vmem>>, vector<8x16xf32>
    tpu.vector_store %arg8[%c0_71, %c112], %203 {strides = array<i32>} : memref<8x128xf32, #tpu.memory_space<vmem>>, vector<8x16xf32>,
    %c7 = arith.constant 7 : index
    %205 = arith.index_cast %arg1 : i32 to index
    %c0_72 = arith.constant 0 : index
    %c0_73 = arith.constant 0 : index
    %206 = vector.load %arg7[%c7, %205, %c0_72, %c0_73] : memref<8x2x8x8xf32, #tpu.memory_space<vmem>>, vector<1x1x8x8xf32>
    %207 = vector.shape_cast %206 : vector<1x1x8x8xf32> to vector<8x8xf32>
    %208 = vector.shape_cast %200 : vector<8x8xf32> to vector<1x1x8x8xf32>
    tpu.vector_store %arg7[%c7, %205, %c0_72, %c0_73], %208 {strides = array<i32>} : memref<8x2x8x8xf32, #tpu.memory_space<vmem>>, vector<1x1x8x8xf32>,
    %c0_74 = arith.constant 0 : index
    %c0_75 = arith.constant 0 : index
    %209 = vector.load %arg8[%c0_74, %c0_75] : memref<8x128xf32, #tpu.memory_space<vmem>>, vector<8x128xf32>
    %210 = arith.addf %209, %4 : vector<8x128xf32>
    %c0_76 = arith.constant 0 : index
    %c0_77 = arith.constant 0 : index
    %c0_78 = arith.constant 0 : index
    %c0_79 = arith.constant 0 : index
    %211 = vector.load %arg5[%c0_76, %c0_77, %c0_78, %c0_79] : memref<1x6x8x128xf32, #tpu.memory_space<vmem>>, vector<1x1x8x128xf32>
    %212 = vector.shape_cast %211 : vector<1x1x8x128xf32> to vector<8x128xf32>
    %c0_80 = arith.constant 0 : index
    %c1_81 = arith.constant 1 : index
    %c0_82 = arith.constant 0 : index
    %c0_83 = arith.constant 0 : index
    %213 = vector.load %arg5[%c0_80, %c1_81, %c0_82, %c0_83] : memref<1x6x8x128xf32, #tpu.memory_space<vmem>>, vector<1x1x8x128xf32>
    %214 = vector.shape_cast %213 : vector<1x1x8x128xf32> to vector<8x128xf32>
    %cst_84 = arith.constant dense<0.000000e+00> : vector<8x128xf32>
    %215 = tpu.matmul %210, %18, %cst_84 {dimension_numbers = #tpu.dot_dimension_numbers<[1], [0], [0], [1], [0, 0, 1, 1], [], []>} : vector<8x128xf32>, vector<128x128xf32>, vector<8x128xf32> -> vector<8x128xf32>
    %cst_85 = arith.constant dense<0.000000e+00> : vector<128xf32>
    %216 = vector.multi_reduction <add>, %215, %cst_85 [0] : vector<8x128xf32> to vector<128xf32>
    %217 = vector.shape_cast %216 : vector<128xf32> to vector<1x128xf32>
    %cst_86 = arith.constant 7.812500e-03 : f32
    %218 = vector.broadcast %cst_86 : f32 to vector<1x128xf32>
    %219 = arith.mulf %217, %218 : vector<1x128xf32>
    %220 = vector.broadcast %219 : vector<1x128xf32> to vector<8x128xf32>
    %221 = arith.subf %210, %220 : vector<8x128xf32>
    %222 = arith.mulf %221, %221 : vector<8x128xf32>
    %cst_87 = arith.constant dense<0.000000e+00> : vector<8x128xf32>
    %223 = tpu.matmul %222, %18, %cst_87 {dimension_numbers = #tpu.dot_dimension_numbers<[1], [0], [0], [1], [0, 0, 1, 1], [], []>} : vector<8x128xf32>, vector<128x128xf32>, vector<8x128xf32> -> vector<8x128xf32>
    %cst_88 = arith.constant dense<0.000000e+00> : vector<128xf32>
    %224 = vector.multi_reduction <add>, %223, %cst_88 [0] : vector<8x128xf32> to vector<128xf32>
    %225 = vector.shape_cast %224 : vector<128xf32> to vector<1x128xf32>
    %cst_89 = arith.constant 7.812500e-03 : f32
    %226 = vector.broadcast %cst_89 : f32 to vector<1x128xf32>
    %227 = arith.mulf %225, %226 : vector<1x128xf32>
    %cst_90 = arith.constant 9.99999974E-6 : f32
    %228 = vector.broadcast %cst_90 : f32 to vector<1x128xf32>
    %229 = arith.addf %227, %228 : vector<1x128xf32>
    %230 = math.rsqrt %229 : vector<1x128xf32>
    %231 = vector.broadcast %230 : vector<1x128xf32> to vector<8x128xf32>
    %232 = arith.mulf %221, %231 : vector<8x128xf32>
    %233 = arith.mulf %232, %212 : vector<8x128xf32>
    %234 = arith.addf %233, %214 : vector<8x128xf32>
    %cst_91 = arith.constant 0.000000e+00 : f32
    %235 = vector.broadcast %cst_91 : f32 to vector<8x128xf32>
    %236 = vector.extract_strided_slice %234 {offsets = [0, 0], sizes = [8, 127], strides = [1, 1]} : vector<8x128xf32> to vector<8x127xf32>
    %c0_92 = arith.constant 0 : index
    %c1_93 = arith.constant 1 : index
    %237 = vector.load %arg8[%c0_92, %c1_93] : memref<8x128xf32, #tpu.memory_space<vmem>>, vector<8x127xf32>
    tpu.vector_store %arg8[%c0_92, %c1_93], %236 {strides = array<i32>} : memref<8x128xf32, #tpu.memory_space<vmem>>, vector<8x127xf32>,
    %c-1_i32 = arith.constant -1 : i32
    %238 = vector.broadcast %c-1_i32 : i32 to vector<8x128xi32>
    %239 = arith.addi %7, %238 : vector<8x128xi32>
    %c0_i32_94 = arith.constant 0 : i32
    %240 = vector.broadcast %c0_i32_94 : i32 to vector<8x128xi32>
    %241 = arith.cmpi sge, %239, %240 : vector<8x128xi32>
    %c-1_i32_95 = arith.constant -1 : i32
    %242 = vector.broadcast %c-1_i32_95 : i32 to vector<8x128xi32>
    %243 = arith.addi %7, %242 : vector<8x128xi32>
    %c16_i32 = arith.constant 16 : i32
    %244 = vector.broadcast %c16_i32 : i32 to vector<8x128xi32>
    %245 = arith.cmpi slt, %243, %244 : vector<8x128xi32>
    %246 = arith.andi %241, %245 : vector<8x128xi1>
    %c0_96 = arith.constant 0 : index
    %c0_97 = arith.constant 0 : index
    %247 = vector.load %arg8[%c0_96, %c0_97] : memref<8x128xf32, #tpu.memory_space<vmem>>, vector<8x128xf32>
    %cst_98 = arith.constant 0.000000e+00 : f32
    %248 = vector.broadcast %cst_98 : f32 to vector<8x128xf32>
    %249 = arith.select %246, %247, %248 : vector<8x128xi1>, vector<8x128xf32>
    %250 = arith.truncf %249 : vector<8x128xf32> to vector<8x128xbf16>
    %c0_99 = arith.constant 0 : index
    %c0_100 = arith.constant 0 : index
    %c0_101 = arith.constant 0 : index
    %c0_102 = arith.constant 0 : index
    %251 = vector.load %arg3[%c0_99, %c0_100, %c0_101, %c0_102] : memref<1x4x8x24xbf16, #tpu.memory_space<vmem>>, vector<1x1x8x8xbf16>
    %252 = vector.shape_cast %251 : vector<1x1x8x8xbf16> to vector<8x8xbf16>
    %cst_103 = arith.constant dense<0.000000e+00> : vector<8x128xf32>
    %253 = tpu.matmul %252, %250, %cst_103 {dimension_numbers = #tpu.dot_dimension_numbers<[1], [0], [0], [1], [0, 0, 1, 1], [], []>} : vector<8x8xbf16>, vector<8x128xbf16>, vector<8x128xf32> -> vector<8x128xf32>
    %254 = arith.addf %235, %253 : vector<8x128xf32>
    %255 = arith.truncf %234 : vector<8x128xf32> to vector<8x128xbf16>
    %c0_104 = arith.constant 0 : index
    %c0_105 = arith.constant 0 : index
    %c0_106 = arith.constant 0 : index
    %c8 = arith.constant 8 : index
    %256 = vector.load %arg3[%c0_104, %c0_105, %c0_106, %c8] : memref<1x4x8x24xbf16, #tpu.memory_space<vmem>>, vector<1x1x8x8xbf16>
    %257 = vector.shape_cast %256 : vector<1x1x8x8xbf16> to vector<8x8xbf16>
    %cst_107 = arith.constant dense<0.000000e+00> : vector<8x128xf32>
    %258 = tpu.matmul %257, %255, %cst_107 {dimension_numbers = #tpu.dot_dimension_numbers<[1], [0], [0], [1], [0, 0, 1, 1], [], []>} : vector<8x8xbf16>, vector<8x128xbf16>, vector<8x128xf32> -> vector<8x128xf32>
    %259 = arith.addf %254, %258 : vector<8x128xf32>
    %260 = vector.extract_strided_slice %234 {offsets = [0, 1], sizes = [8, 127], strides = [1, 1]} : vector<8x128xf32> to vector<8x127xf32>
    %c0_108 = arith.constant 0 : index
    %c0_109 = arith.constant 0 : index
    %261 = vector.load %arg8[%c0_108, %c0_109] : memref<8x128xf32, #tpu.memory_space<vmem>>, vector<8x127xf32>
    tpu.vector_store %arg8[%c0_108, %c0_109], %260 {strides = array<i32>} : memref<8x128xf32, #tpu.memory_space<vmem>>, vector<8x127xf32>,
    %c1_i32 = arith.constant 1 : i32
    %262 = vector.broadcast %c1_i32 : i32 to vector<8x128xi32>
    %263 = arith.addi %7, %262 : vector<8x128xi32>
    %c0_i32_110 = arith.constant 0 : i32
    %264 = vector.broadcast %c0_i32_110 : i32 to vector<8x128xi32>
    %265 = arith.cmpi sge, %263, %264 : vector<8x128xi32>
    %c1_i32_111 = arith.constant 1 : i32
    %266 = vector.broadcast %c1_i32_111 : i32 to vector<8x128xi32>
    %267 = arith.addi %7, %266 : vector<8x128xi32>
    %c16_i32_112 = arith.constant 16 : i32
    %268 = vector.broadcast %c16_i32_112 : i32 to vector<8x128xi32>
    %269 = arith.cmpi slt, %267, %268 : vector<8x128xi32>
    %270 = arith.andi %265, %269 : vector<8x128xi1>
    %c0_113 = arith.constant 0 : index
    %c0_114 = arith.constant 0 : index
    %271 = vector.load %arg8[%c0_113, %c0_114] : memref<8x128xf32, #tpu.memory_space<vmem>>, vector<8x128xf32>
    %cst_115 = arith.constant 0.000000e+00 : f32
    %272 = vector.broadcast %cst_115 : f32 to vector<8x128xf32>
    %273 = arith.select %270, %271, %272 : vector<8x128xi1>, vector<8x128xf32>
    %274 = arith.truncf %273 : vector<8x128xf32> to vector<8x128xbf16>
    %c0_116 = arith.constant 0 : index
    %c0_117 = arith.constant 0 : index
    %c0_118 = arith.constant 0 : index
    %c16_119 = arith.constant 16 : index
    %275 = vector.load %arg3[%c0_116, %c0_117, %c0_118, %c16_119] : memref<1x4x8x24xbf16, #tpu.memory_space<vmem>>, vector<1x1x8x8xbf16>
    %276 = vector.shape_cast %275 : vector<1x1x8x8xbf16> to vector<8x8xbf16>
    %cst_120 = arith.constant dense<0.000000e+00> : vector<8x128xf32>
    %277 = tpu.matmul %276, %274, %cst_120 {dimension_numbers = #tpu.dot_dimension_numbers<[1], [0], [0], [1], [0, 0, 1, 1], [], []>} : vector<8x8xbf16>, vector<8x128xbf16>, vector<8x128xf32> -> vector<8x128xf32>
    %278 = arith.addf %259, %277 : vector<8x128xf32>
    %c0_121 = arith.constant 0 : index
    %c3_122 = arith.constant 3 : index
    %c0_123 = arith.constant 0 : index
    %c0_124 = arith.constant 0 : index
    %279 = vector.load %arg4[%c0_121, %c3_122, %c0_123, %c0_124] : memref<1x7x8x1xf32, #tpu.memory_space<vmem>>, vector<1x1x8x1xf32>
    %280 = vector.shape_cast %279 : vector<1x1x8x1xf32> to vector<8x1xf32>
    %281 = vector.broadcast %280 : vector<8x1xf32> to vector<8x128xf32>
    %282 = arith.addf %278, %281 : vector<8x128xf32>
    %283 = arith.addf %282, %234 : vector<8x128xf32>
    %c0_125 = arith.constant 0 : index
    %c2_126 = arith.constant 2 : index
    %c0_127 = arith.constant 0 : index
    %c0_128 = arith.constant 0 : index
    %284 = vector.load %arg5[%c0_125, %c2_126, %c0_127, %c0_128] : memref<1x6x8x128xf32, #tpu.memory_space<vmem>>, vector<1x1x8x128xf32>
    %285 = vector.shape_cast %284 : vector<1x1x8x128xf32> to vector<8x128xf32>
    %c0_129 = arith.constant 0 : index
    %c3_130 = arith.constant 3 : index
    %c0_131 = arith.constant 0 : index
    %c0_132 = arith.constant 0 : index
    %286 = vector.load %arg5[%c0_129, %c3_130, %c0_131, %c0_132] : memref<1x6x8x128xf32, #tpu.memory_space<vmem>>, vector<1x1x8x128xf32>
    %287 = vector.shape_cast %286 : vector<1x1x8x128xf32> to vector<8x128xf32>
    %cst_133 = arith.constant dense<0.000000e+00> : vector<8x128xf32>
    %288 = tpu.matmul %283, %18, %cst_133 {dimension_numbers = #tpu.dot_dimension_numbers<[1], [0], [0], [1], [0, 0, 1, 1], [], []>} : vector<8x128xf32>, vector<128x128xf32>, vector<8x128xf32> -> vector<8x128xf32>
    %cst_134 = arith.constant dense<0.000000e+00> : vector<128xf32>
    %289 = vector.multi_reduction <add>, %288, %cst_134 [0] : vector<8x128xf32> to vector<128xf32>
    %290 = vector.shape_cast %289 : vector<128xf32> to vector<1x128xf32>
    %cst_135 = arith.constant 7.812500e-03 : f32
    %291 = vector.broadcast %cst_135 : f32 to vector<1x128xf32>
    %292 = arith.mulf %290, %291 : vector<1x128xf32>
    %293 = vector.broadcast %292 : vector<1x128xf32> to vector<8x128xf32>
    %294 = arith.subf %283, %293 : vector<8x128xf32>
    %295 = arith.mulf %294, %294 : vector<8x128xf32>
    %cst_136 = arith.constant dense<0.000000e+00> : vector<8x128xf32>
    %296 = tpu.matmul %295, %18, %cst_136 {dimension_numbers = #tpu.dot_dimension_numbers<[1], [0], [0], [1], [0, 0, 1, 1], [], []>} : vector<8x128xf32>, vector<128x128xf32>, vector<8x128xf32> -> vector<8x128xf32>
    %cst_137 = arith.constant dense<0.000000e+00> : vector<128xf32>
    %297 = vector.multi_reduction <add>, %296, %cst_137 [0] : vector<8x128xf32> to vector<128xf32>
    %298 = vector.shape_cast %297 : vector<128xf32> to vector<1x128xf32>
    %cst_138 = arith.constant 7.812500e-03 : f32
    %299 = vector.broadcast %cst_138 : f32 to vector<1x128xf32>
    %300 = arith.mulf %298, %299 : vector<1x128xf32>
    %cst_139 = arith.constant 9.99999974E-6 : f32
    %301 = vector.broadcast %cst_139 : f32 to vector<1x128xf32>
    %302 = arith.addf %300, %301 : vector<1x128xf32>
    %303 = math.rsqrt %302 : vector<1x128xf32>
    %304 = vector.broadcast %303 : vector<1x128xf32> to vector<8x128xf32>
    %305 = arith.mulf %294, %304 : vector<8x128xf32>
    %306 = arith.mulf %305, %285 : vector<8x128xf32>
    %307 = arith.addf %306, %287 : vector<8x128xf32>
    %cst_140 = arith.constant 0.000000e+00 : f32
    %308 = vector.broadcast %cst_140 : f32 to vector<8x128xf32>
    %309 = vector.extract_strided_slice %307 {offsets = [0, 0], sizes = [8, 127], strides = [1, 1]} : vector<8x128xf32> to vector<8x127xf32>
    %c0_141 = arith.constant 0 : index
    %c1_142 = arith.constant 1 : index
    %310 = vector.load %arg8[%c0_141, %c1_142] : memref<8x128xf32, #tpu.memory_space<vmem>>, vector<8x127xf32>
    tpu.vector_store %arg8[%c0_141, %c1_142], %309 {strides = array<i32>} : memref<8x128xf32, #tpu.memory_space<vmem>>, vector<8x127xf32>,
    %c-1_i32_143 = arith.constant -1 : i32
    %311 = vector.broadcast %c-1_i32_143 : i32 to vector<8x128xi32>
    %312 = arith.addi %7, %311 : vector<8x128xi32>
    %c0_i32_144 = arith.constant 0 : i32
    %313 = vector.broadcast %c0_i32_144 : i32 to vector<8x128xi32>
    %314 = arith.cmpi sge, %312, %313 : vector<8x128xi32>
    %c-1_i32_145 = arith.constant -1 : i32
    %315 = vector.broadcast %c-1_i32_145 : i32 to vector<8x128xi32>
    %316 = arith.addi %7, %315 : vector<8x128xi32>
    %c16_i32_146 = arith.constant 16 : i32
    %317 = vector.broadcast %c16_i32_146 : i32 to vector<8x128xi32>
    %318 = arith.cmpi slt, %316, %317 : vector<8x128xi32>
    %319 = arith.andi %314, %318 : vector<8x128xi1>
    %c0_147 = arith.constant 0 : index
    %c0_148 = arith.constant 0 : index
    %320 = vector.load %arg8[%c0_147, %c0_148] : memref<8x128xf32, #tpu.memory_space<vmem>>, vector<8x128xf32>
    %cst_149 = arith.constant 0.000000e+00 : f32
    %321 = vector.broadcast %cst_149 : f32 to vector<8x128xf32>
    %322 = arith.select %319, %320, %321 : vector<8x128xi1>, vector<8x128xf32>
    %323 = arith.truncf %322 : vector<8x128xf32> to vector<8x128xbf16>
    %c0_150 = arith.constant 0 : index
    %c1_151 = arith.constant 1 : index
    %c0_152 = arith.constant 0 : index
    %c0_153 = arith.constant 0 : index
    %324 = vector.load %arg3[%c0_150, %c1_151, %c0_152, %c0_153] : memref<1x4x8x24xbf16, #tpu.memory_space<vmem>>, vector<1x1x8x8xbf16>
    %325 = vector.shape_cast %324 : vector<1x1x8x8xbf16> to vector<8x8xbf16>
    %cst_154 = arith.constant dense<0.000000e+00> : vector<8x128xf32>
    %326 = tpu.matmul %325, %323, %cst_154 {dimension_numbers = #tpu.dot_dimension_numbers<[1], [0], [0], [1], [0, 0, 1, 1], [], []>} : vector<8x8xbf16>, vector<8x128xbf16>, vector<8x128xf32> -> vector<8x128xf32>
    %327 = arith.addf %308, %326 : vector<8x128xf32>
    %328 = arith.truncf %307 : vector<8x128xf32> to vector<8x128xbf16>
    %c0_155 = arith.constant 0 : index
    %c1_156 = arith.constant 1 : index
    %c0_157 = arith.constant 0 : index
    %c8_158 = arith.constant 8 : index
    %329 = vector.load %arg3[%c0_155, %c1_156, %c0_157, %c8_158] : memref<1x4x8x24xbf16, #tpu.memory_space<vmem>>, vector<1x1x8x8xbf16>
    %330 = vector.shape_cast %329 : vector<1x1x8x8xbf16> to vector<8x8xbf16>
    %cst_159 = arith.constant dense<0.000000e+00> : vector<8x128xf32>
    %331 = tpu.matmul %330, %328, %cst_159 {dimension_numbers = #tpu.dot_dimension_numbers<[1], [0], [0], [1], [0, 0, 1, 1], [], []>} : vector<8x8xbf16>, vector<8x128xbf16>, vector<8x128xf32> -> vector<8x128xf32>
    %332 = arith.addf %327, %331 : vector<8x128xf32>
    %333 = vector.extract_strided_slice %307 {offsets = [0, 1], sizes = [8, 127], strides = [1, 1]} : vector<8x128xf32> to vector<8x127xf32>
    %c0_160 = arith.constant 0 : index
    %c0_161 = arith.constant 0 : index
    %334 = vector.load %arg8[%c0_160, %c0_161] : memref<8x128xf32, #tpu.memory_space<vmem>>, vector<8x127xf32>
    tpu.vector_store %arg8[%c0_160, %c0_161], %333 {strides = array<i32>} : memref<8x128xf32, #tpu.memory_space<vmem>>, vector<8x127xf32>,
    %c1_i32_162 = arith.constant 1 : i32
    %335 = vector.broadcast %c1_i32_162 : i32 to vector<8x128xi32>
    %336 = arith.addi %7, %335 : vector<8x128xi32>
    %c0_i32_163 = arith.constant 0 : i32
    %337 = vector.broadcast %c0_i32_163 : i32 to vector<8x128xi32>
    %338 = arith.cmpi sge, %336, %337 : vector<8x128xi32>
    %c1_i32_164 = arith.constant 1 : i32
    %339 = vector.broadcast %c1_i32_164 : i32 to vector<8x128xi32>
    %340 = arith.addi %7, %339 : vector<8x128xi32>
    %c16_i32_165 = arith.constant 16 : i32
    %341 = vector.broadcast %c16_i32_165 : i32 to vector<8x128xi32>
    %342 = arith.cmpi slt, %340, %341 : vector<8x128xi32>
    %343 = arith.andi %338, %342 : vector<8x128xi1>
    %c0_166 = arith.constant 0 : index
    %c0_167 = arith.constant 0 : index
    %344 = vector.load %arg8[%c0_166, %c0_167] : memref<8x128xf32, #tpu.memory_space<vmem>>, vector<8x128xf32>
    %cst_168 = arith.constant 0.000000e+00 : f32
    %345 = vector.broadcast %cst_168 : f32 to vector<8x128xf32>
    %346 = arith.select %343, %344, %345 : vector<8x128xi1>, vector<8x128xf32>
    %347 = arith.truncf %346 : vector<8x128xf32> to vector<8x128xbf16>
    %c0_169 = arith.constant 0 : index
    %c1_170 = arith.constant 1 : index
    %c0_171 = arith.constant 0 : index
    %c16_172 = arith.constant 16 : index
    %348 = vector.load %arg3[%c0_169, %c1_170, %c0_171, %c16_172] : memref<1x4x8x24xbf16, #tpu.memory_space<vmem>>, vector<1x1x8x8xbf16>
    %349 = vector.shape_cast %348 : vector<1x1x8x8xbf16> to vector<8x8xbf16>
    %cst_173 = arith.constant dense<0.000000e+00> : vector<8x128xf32>
    %350 = tpu.matmul %349, %347, %cst_173 {dimension_numbers = #tpu.dot_dimension_numbers<[1], [0], [0], [1], [0, 0, 1, 1], [], []>} : vector<8x8xbf16>, vector<8x128xbf16>, vector<8x128xf32> -> vector<8x128xf32>
    %351 = arith.addf %332, %350 : vector<8x128xf32>
    %c0_174 = arith.constant 0 : index
    %c4_175 = arith.constant 4 : index
    %c0_176 = arith.constant 0 : index
    %c0_177 = arith.constant 0 : index
    %352 = vector.load %arg4[%c0_174, %c4_175, %c0_176, %c0_177] : memref<1x7x8x1xf32, #tpu.memory_space<vmem>>, vector<1x1x8x1xf32>
    %353 = vector.shape_cast %352 : vector<1x1x8x1xf32> to vector<8x1xf32>
    %354 = vector.broadcast %353 : vector<8x1xf32> to vector<8x128xf32>
    %355 = arith.addf %351, %354 : vector<8x128xf32>
    %356 = arith.addf %355, %307 : vector<8x128xf32>
    %c0_178 = arith.constant 0 : index
    %c4_179 = arith.constant 4 : index
    %c0_180 = arith.constant 0 : index
    %c0_181 = arith.constant 0 : index
    %357 = vector.load %arg5[%c0_178, %c4_179, %c0_180, %c0_181] : memref<1x6x8x128xf32, #tpu.memory_space<vmem>>, vector<1x1x8x128xf32>
    %358 = vector.shape_cast %357 : vector<1x1x8x128xf32> to vector<8x128xf32>
    %c0_182 = arith.constant 0 : index
    %c5_183 = arith.constant 5 : index
    %c0_184 = arith.constant 0 : index
    %c0_185 = arith.constant 0 : index
    %359 = vector.load %arg5[%c0_182, %c5_183, %c0_184, %c0_185] : memref<1x6x8x128xf32, #tpu.memory_space<vmem>>, vector<1x1x8x128xf32>
    %360 = vector.shape_cast %359 : vector<1x1x8x128xf32> to vector<8x128xf32>
    %cst_186 = arith.constant dense<0.000000e+00> : vector<8x128xf32>
    %361 = tpu.matmul %356, %18, %cst_186 {dimension_numbers = #tpu.dot_dimension_numbers<[1], [0], [0], [1], [0, 0, 1, 1], [], []>} : vector<8x128xf32>, vector<128x128xf32>, vector<8x128xf32> -> vector<8x128xf32>
    %cst_187 = arith.constant dense<0.000000e+00> : vector<128xf32>
    %362 = vector.multi_reduction <add>, %361, %cst_187 [0] : vector<8x128xf32> to vector<128xf32>
    %363 = vector.shape_cast %362 : vector<128xf32> to vector<1x128xf32>
    %cst_188 = arith.constant 7.812500e-03 : f32
    %364 = vector.broadcast %cst_188 : f32 to vector<1x128xf32>
    %365 = arith.mulf %363, %364 : vector<1x128xf32>
    %366 = vector.broadcast %365 : vector<1x128xf32> to vector<8x128xf32>
    %367 = arith.subf %356, %366 : vector<8x128xf32>
    %368 = arith.mulf %367, %367 : vector<8x128xf32>
    %cst_189 = arith.constant dense<0.000000e+00> : vector<8x128xf32>
    %369 = tpu.matmul %368, %18, %cst_189 {dimension_numbers = #tpu.dot_dimension_numbers<[1], [0], [0], [1], [0, 0, 1, 1], [], []>} : vector<8x128xf32>, vector<128x128xf32>, vector<8x128xf32> -> vector<8x128xf32>
    %cst_190 = arith.constant dense<0.000000e+00> : vector<128xf32>
    %370 = vector.multi_reduction <add>, %369, %cst_190 [0] : vector<8x128xf32> to vector<128xf32>
    %371 = vector.shape_cast %370 : vector<128xf32> to vector<1x128xf32>
    %cst_191 = arith.constant 7.812500e-03 : f32
    %372 = vector.broadcast %cst_191 : f32 to vector<1x128xf32>
    %373 = arith.mulf %371, %372 : vector<1x128xf32>
    %cst_192 = arith.constant 9.99999974E-6 : f32
    %374 = vector.broadcast %cst_192 : f32 to vector<1x128xf32>
    %375 = arith.addf %373, %374 : vector<1x128xf32>
    %376 = math.rsqrt %375 : vector<1x128xf32>
    %377 = vector.broadcast %376 : vector<1x128xf32> to vector<8x128xf32>
    %378 = arith.mulf %367, %377 : vector<8x128xf32>
    %379 = arith.mulf %378, %358 : vector<8x128xf32>
    %380 = arith.addf %379, %360 : vector<8x128xf32>
    %cst_193 = arith.constant 0.000000e+00 : f32
    %381 = vector.broadcast %cst_193 : f32 to vector<8x128xf32>
    %382 = vector.extract_strided_slice %380 {offsets = [0, 0], sizes = [8, 127], strides = [1, 1]} : vector<8x128xf32> to vector<8x127xf32>
    %c0_194 = arith.constant 0 : index
    %c1_195 = arith.constant 1 : index
    %383 = vector.load %arg8[%c0_194, %c1_195] : memref<8x128xf32, #tpu.memory_space<vmem>>, vector<8x127xf32>
    tpu.vector_store %arg8[%c0_194, %c1_195], %382 {strides = array<i32>} : memref<8x128xf32, #tpu.memory_space<vmem>>, vector<8x127xf32>,
    %c-1_i32_196 = arith.constant -1 : i32
    %384 = vector.broadcast %c-1_i32_196 : i32 to vector<8x128xi32>
    %385 = arith.addi %7, %384 : vector<8x128xi32>
    %c0_i32_197 = arith.constant 0 : i32
    %386 = vector.broadcast %c0_i32_197 : i32 to vector<8x128xi32>
    %387 = arith.cmpi sge, %385, %386 : vector<8x128xi32>
    %c-1_i32_198 = arith.constant -1 : i32
    %388 = vector.broadcast %c-1_i32_198 : i32 to vector<8x128xi32>
    %389 = arith.addi %7, %388 : vector<8x128xi32>
    %c16_i32_199 = arith.constant 16 : i32
    %390 = vector.broadcast %c16_i32_199 : i32 to vector<8x128xi32>
    %391 = arith.cmpi slt, %389, %390 : vector<8x128xi32>
    %392 = arith.andi %387, %391 : vector<8x128xi1>
    %c0_200 = arith.constant 0 : index
    %c0_201 = arith.constant 0 : index
    %393 = vector.load %arg8[%c0_200, %c0_201] : memref<8x128xf32, #tpu.memory_space<vmem>>, vector<8x128xf32>
    %cst_202 = arith.constant 0.000000e+00 : f32
    %394 = vector.broadcast %cst_202 : f32 to vector<8x128xf32>
    %395 = arith.select %392, %393, %394 : vector<8x128xi1>, vector<8x128xf32>
    %396 = arith.truncf %395 : vector<8x128xf32> to vector<8x128xbf16>
    %c0_203 = arith.constant 0 : index
    %c2_204 = arith.constant 2 : index
    %c0_205 = arith.constant 0 : index
    %c0_206 = arith.constant 0 : index
    %397 = vector.load %arg3[%c0_203, %c2_204, %c0_205, %c0_206] : memref<1x4x8x24xbf16, #tpu.memory_space<vmem>>, vector<1x1x8x8xbf16>
    %398 = vector.shape_cast %397 : vector<1x1x8x8xbf16> to vector<8x8xbf16>
    %cst_207 = arith.constant dense<0.000000e+00> : vector<8x128xf32>
    %399 = tpu.matmul %398, %396, %cst_207 {dimension_numbers = #tpu.dot_dimension_numbers<[1], [0], [0], [1], [0, 0, 1, 1], [], []>} : vector<8x8xbf16>, vector<8x128xbf16>, vector<8x128xf32> -> vector<8x128xf32>
    %400 = arith.addf %381, %399 : vector<8x128xf32>
    %401 = arith.truncf %380 : vector<8x128xf32> to vector<8x128xbf16>
    %c0_208 = arith.constant 0 : index
    %c2_209 = arith.constant 2 : index
    %c0_210 = arith.constant 0 : index
    %c8_211 = arith.constant 8 : index
    %402 = vector.load %arg3[%c0_208, %c2_209, %c0_210, %c8_211] : memref<1x4x8x24xbf16, #tpu.memory_space<vmem>>, vector<1x1x8x8xbf16>
    %403 = vector.shape_cast %402 : vector<1x1x8x8xbf16> to vector<8x8xbf16>
    %cst_212 = arith.constant dense<0.000000e+00> : vector<8x128xf32>
    %404 = tpu.matmul %403, %401, %cst_212 {dimension_numbers = #tpu.dot_dimension_numbers<[1], [0], [0], [1], [0, 0, 1, 1], [], []>} : vector<8x8xbf16>, vector<8x128xbf16>, vector<8x128xf32> -> vector<8x128xf32>
    %405 = arith.addf %400, %404 : vector<8x128xf32>
    %406 = vector.extract_strided_slice %380 {offsets = [0, 1], sizes = [8, 127], strides = [1, 1]} : vector<8x128xf32> to vector<8x127xf32>
    %c0_213 = arith.constant 0 : index
    %c0_214 = arith.constant 0 : index
    %407 = vector.load %arg8[%c0_213, %c0_214] : memref<8x128xf32, #tpu.memory_space<vmem>>, vector<8x127xf32>
    tpu.vector_store %arg8[%c0_213, %c0_214], %406 {strides = array<i32>} : memref<8x128xf32, #tpu.memory_space<vmem>>, vector<8x127xf32>,
    %c1_i32_215 = arith.constant 1 : i32
    %408 = vector.broadcast %c1_i32_215 : i32 to vector<8x128xi32>
    %409 = arith.addi %7, %408 : vector<8x128xi32>
    %c0_i32_216 = arith.constant 0 : i32
    %410 = vector.broadcast %c0_i32_216 : i32 to vector<8x128xi32>
    %411 = arith.cmpi sge, %409, %410 : vector<8x128xi32>
    %c1_i32_217 = arith.constant 1 : i32
    %412 = vector.broadcast %c1_i32_217 : i32 to vector<8x128xi32>
    %413 = arith.addi %7, %412 : vector<8x128xi32>
    %c16_i32_218 = arith.constant 16 : i32
    %414 = vector.broadcast %c16_i32_218 : i32 to vector<8x128xi32>
    %415 = arith.cmpi slt, %413, %414 : vector<8x128xi32>
    %416 = arith.andi %411, %415 : vector<8x128xi1>
    %c0_219 = arith.constant 0 : index
    %c0_220 = arith.constant 0 : index
    %417 = vector.load %arg8[%c0_219, %c0_220] : memref<8x128xf32, #tpu.memory_space<vmem>>, vector<8x128xf32>
    %cst_221 = arith.constant 0.000000e+00 : f32
    %418 = vector.broadcast %cst_221 : f32 to vector<8x128xf32>
    %419 = arith.select %416, %417, %418 : vector<8x128xi1>, vector<8x128xf32>
    %420 = arith.truncf %419 : vector<8x128xf32> to vector<8x128xbf16>
    %c0_222 = arith.constant 0 : index
    %c2_223 = arith.constant 2 : index
    %c0_224 = arith.constant 0 : index
    %c16_225 = arith.constant 16 : index
    %421 = vector.load %arg3[%c0_222, %c2_223, %c0_224, %c16_225] : memref<1x4x8x24xbf16, #tpu.memory_space<vmem>>, vector<1x1x8x8xbf16>
    %422 = vector.shape_cast %421 : vector<1x1x8x8xbf16> to vector<8x8xbf16>
    %cst_226 = arith.constant dense<0.000000e+00> : vector<8x128xf32>
    %423 = tpu.matmul %422, %420, %cst_226 {dimension_numbers = #tpu.dot_dimension_numbers<[1], [0], [0], [1], [0, 0, 1, 1], [], []>} : vector<8x8xbf16>, vector<8x128xbf16>, vector<8x128xf32> -> vector<8x128xf32>
    %424 = arith.addf %405, %423 : vector<8x128xf32>
    %c0_227 = arith.constant 0 : index
    %c5_228 = arith.constant 5 : index
    %c0_229 = arith.constant 0 : index
    %c0_230 = arith.constant 0 : index
    %425 = vector.load %arg4[%c0_227, %c5_228, %c0_229, %c0_230] : memref<1x7x8x1xf32, #tpu.memory_space<vmem>>, vector<1x1x8x1xf32>
    %426 = vector.shape_cast %425 : vector<1x1x8x1xf32> to vector<8x1xf32>
    %427 = vector.broadcast %426 : vector<8x1xf32> to vector<8x128xf32>
    %428 = arith.addf %424, %427 : vector<8x128xf32>
    %cst_231 = arith.constant 0.000000e+00 : f32
    %429 = vector.broadcast %cst_231 : f32 to vector<8x128xf32>
    %430 = vector.extract_strided_slice %428 {offsets = [0, 0], sizes = [8, 127], strides = [1, 1]} : vector<8x128xf32> to vector<8x127xf32>
    %c0_232 = arith.constant 0 : index
    %c1_233 = arith.constant 1 : index
    %431 = vector.load %arg8[%c0_232, %c1_233] : memref<8x128xf32, #tpu.memory_space<vmem>>, vector<8x127xf32>
    tpu.vector_store %arg8[%c0_232, %c1_233], %430 {strides = array<i32>} : memref<8x128xf32, #tpu.memory_space<vmem>>, vector<8x127xf32>,
    %c-1_i32_234 = arith.constant -1 : i32
    %432 = vector.broadcast %c-1_i32_234 : i32 to vector<8x128xi32>
    %433 = arith.addi %7, %432 : vector<8x128xi32>
    %c0_i32_235 = arith.constant 0 : i32
    %434 = vector.broadcast %c0_i32_235 : i32 to vector<8x128xi32>
    %435 = arith.cmpi sge, %433, %434 : vector<8x128xi32>
    %c-1_i32_236 = arith.constant -1 : i32
    %436 = vector.broadcast %c-1_i32_236 : i32 to vector<8x128xi32>
    %437 = arith.addi %7, %436 : vector<8x128xi32>
    %c16_i32_237 = arith.constant 16 : i32
    %438 = vector.broadcast %c16_i32_237 : i32 to vector<8x128xi32>
    %439 = arith.cmpi slt, %437, %438 : vector<8x128xi32>
    %440 = arith.andi %435, %439 : vector<8x128xi1>
    %c0_238 = arith.constant 0 : index
    %c0_239 = arith.constant 0 : index
    %441 = vector.load %arg8[%c0_238, %c0_239] : memref<8x128xf32, #tpu.memory_space<vmem>>, vector<8x128xf32>
    %cst_240 = arith.constant 0.000000e+00 : f32
    %442 = vector.broadcast %cst_240 : f32 to vector<8x128xf32>
    %443 = arith.select %440, %441, %442 : vector<8x128xi1>, vector<8x128xf32>
    %444 = arith.truncf %443 : vector<8x128xf32> to vector<8x128xbf16>
    %c0_241 = arith.constant 0 : index
    %c3_242 = arith.constant 3 : index
    %c0_243 = arith.constant 0 : index
    %c0_244 = arith.constant 0 : index
    %445 = vector.load %arg3[%c0_241, %c3_242, %c0_243, %c0_244] : memref<1x4x8x24xbf16, #tpu.memory_space<vmem>>, vector<1x1x8x8xbf16>
    %446 = vector.shape_cast %445 : vector<1x1x8x8xbf16> to vector<8x8xbf16>
    %cst_245 = arith.constant dense<0.000000e+00> : vector<8x128xf32>
    %447 = tpu.matmul %446, %444, %cst_245 {dimension_numbers = #tpu.dot_dimension_numbers<[1], [0], [0], [1], [0, 0, 1, 1], [], []>} : vector<8x8xbf16>, vector<8x128xbf16>, vector<8x128xf32> -> vector<8x128xf32>
    %448 = arith.addf %429, %447 : vector<8x128xf32>
    %449 = arith.truncf %428 : vector<8x128xf32> to vector<8x128xbf16>
    %c0_246 = arith.constant 0 : index
    %c3_247 = arith.constant 3 : index
    %c0_248 = arith.constant 0 : index
    %c8_249 = arith.constant 8 : index
    %450 = vector.load %arg3[%c0_246, %c3_247, %c0_248, %c8_249] : memref<1x4x8x24xbf16, #tpu.memory_space<vmem>>, vector<1x1x8x8xbf16>
    %451 = vector.shape_cast %450 : vector<1x1x8x8xbf16> to vector<8x8xbf16>
    %cst_250 = arith.constant dense<0.000000e+00> : vector<8x128xf32>
    %452 = tpu.matmul %451, %449, %cst_250 {dimension_numbers = #tpu.dot_dimension_numbers<[1], [0], [0], [1], [0, 0, 1, 1], [], []>} : vector<8x8xbf16>, vector<8x128xbf16>, vector<8x128xf32> -> vector<8x128xf32>
    %453 = arith.addf %448, %452 : vector<8x128xf32>
    %454 = vector.extract_strided_slice %428 {offsets = [0, 1], sizes = [8, 127], strides = [1, 1]} : vector<8x128xf32> to vector<8x127xf32>
    %c0_251 = arith.constant 0 : index
    %c0_252 = arith.constant 0 : index
    %455 = vector.load %arg8[%c0_251, %c0_252] : memref<8x128xf32, #tpu.memory_space<vmem>>, vector<8x127xf32>
    tpu.vector_store %arg8[%c0_251, %c0_252], %454 {strides = array<i32>} : memref<8x128xf32, #tpu.memory_space<vmem>>, vector<8x127xf32>,
    %c1_i32_253 = arith.constant 1 : i32
    %456 = vector.broadcast %c1_i32_253 : i32 to vector<8x128xi32>
    %457 = arith.addi %7, %456 : vector<8x128xi32>
    %c0_i32_254 = arith.constant 0 : i32
    %458 = vector.broadcast %c0_i32_254 : i32 to vector<8x128xi32>
    %459 = arith.cmpi sge, %457, %458 : vector<8x128xi32>
    %c1_i32_255 = arith.constant 1 : i32
    %460 = vector.broadcast %c1_i32_255 : i32 to vector<8x128xi32>
    %461 = arith.addi %7, %460 : vector<8x128xi32>
    %c16_i32_256 = arith.constant 16 : i32
    %462 = vector.broadcast %c16_i32_256 : i32 to vector<8x128xi32>
    %463 = arith.cmpi slt, %461, %462 : vector<8x128xi32>
    %464 = arith.andi %459, %463 : vector<8x128xi1>
    %c0_257 = arith.constant 0 : index
    %c0_258 = arith.constant 0 : index
    %465 = vector.load %arg8[%c0_257, %c0_258] : memref<8x128xf32, #tpu.memory_space<vmem>>, vector<8x128xf32>
    %cst_259 = arith.constant 0.000000e+00 : f32
    %466 = vector.broadcast %cst_259 : f32 to vector<8x128xf32>
    %467 = arith.select %464, %465, %466 : vector<8x128xi1>, vector<8x128xf32>
    %468 = arith.truncf %467 : vector<8x128xf32> to vector<8x128xbf16>
    %c0_260 = arith.constant 0 : index
    %c3_261 = arith.constant 3 : index
    %c0_262 = arith.constant 0 : index
    %c16_263 = arith.constant 16 : index
    %469 = vector.load %arg3[%c0_260, %c3_261, %c0_262, %c16_263] : memref<1x4x8x24xbf16, #tpu.memory_space<vmem>>, vector<1x1x8x8xbf16>
    %470 = vector.shape_cast %469 : vector<1x1x8x8xbf16> to vector<8x8xbf16>
    %cst_264 = arith.constant dense<0.000000e+00> : vector<8x128xf32>
    %471 = tpu.matmul %470, %468, %cst_264 {dimension_numbers = #tpu.dot_dimension_numbers<[1], [0], [0], [1], [0, 0, 1, 1], [], []>} : vector<8x8xbf16>, vector<8x128xbf16>, vector<8x128xf32> -> vector<8x128xf32>
    %472 = arith.addf %453, %471 : vector<8x128xf32>
    %c0_265 = arith.constant 0 : index
    %c6_266 = arith.constant 6 : index
    %c0_267 = arith.constant 0 : index
    %c0_268 = arith.constant 0 : index
    %473 = vector.load %arg4[%c0_265, %c6_266, %c0_267, %c0_268] : memref<1x7x8x1xf32, #tpu.memory_space<vmem>>, vector<1x1x8x1xf32>
    %474 = vector.shape_cast %473 : vector<1x1x8x1xf32> to vector<8x1xf32>
    %475 = vector.broadcast %474 : vector<8x1xf32> to vector<8x128xf32>
    %476 = arith.addf %472, %475 : vector<8x128xf32>
    %c0_269 = arith.constant 0 : index
    %c0_270 = arith.constant 0 : index
    %c0_271 = arith.constant 0 : index
    %477 = vector.load %arg6[%c0_269, %c0_270, %c0_271] : memref<1x8x128xf32, #tpu.memory_space<vmem>>, vector<1x8x128xf32>
    %478 = vector.shape_cast %477 : vector<1x8x128xf32> to vector<8x128xf32>
    %479 = vector.shape_cast %476 : vector<8x128xf32> to vector<1x8x128xf32>
    tpu.vector_store %arg6[%c0_269, %c0_270, %c0_271], %479 {strides = array<i32>} : memref<1x8x128xf32, #tpu.memory_space<vmem>>, vector<1x8x128xf32>,
    return
  }
  func.func @transform_0(%arg0: i32, %arg1: i32) -> (i32, i32, i32) {
    %c0_i32 = arith.constant 0 : i32
    %c0_i32_0 = arith.constant 0 : i32
    %c0_i32_1 = arith.constant 0 : i32
    return %arg0, %c0_i32, %c0_i32_0 : i32, i32, i32
  }
  func.func @transform_1(%arg0: i32, %arg1: i32) -> (i32, i32, i32, i32) {
    %c0_i32 = arith.constant 0 : i32
    %c0_i32_0 = arith.constant 0 : i32
    %c0_i32_1 = arith.constant 0 : i32
    %c0_i32_2 = arith.constant 0 : i32
    return %arg1, %c0_i32, %c0_i32_0, %c0_i32_1 : i32, i32, i32, i32
  }
  func.func @transform_2(%arg0: i32, %arg1: i32) -> (i32, i32, i32, i32) {
    %c0_i32 = arith.constant 0 : i32
    %c0_i32_0 = arith.constant 0 : i32
    %c0_i32_1 = arith.constant 0 : i32
    %c0_i32_2 = arith.constant 0 : i32
    return %arg1, %c0_i32, %c0_i32_0, %c0_i32_1 : i32, i32, i32, i32
  }
  func.func @transform_3(%arg0: i32, %arg1: i32) -> (i32, i32, i32, i32) {
    %c0_i32 = arith.constant 0 : i32
    %c0_i32_0 = arith.constant 0 : i32
    %c0_i32_1 = arith.constant 0 : i32
    %c0_i32_2 = arith.constant 0 : i32
    return %arg1, %c0_i32, %c0_i32_0, %c0_i32_1 : i32, i32, i32, i32
  }
  func.func @transform_4(%arg0: i32, %arg1: i32) -> (i32, i32, i32) {
    %c0_i32 = arith.constant 0 : i32
    %c0_i32_0 = arith.constant 0 : i32
    %c0_i32_1 = arith.constant 0 : i32
    return %arg0, %c0_i32, %c0_i32_0 : i32, i32, i32
  }
  func.func @transform_5(%arg0: i32, %arg1: i32) -> (i32, i32, i32, i32) {
    %c0_i32 = arith.constant 0 : i32
    %c0_i32_0 = arith.constant 0 : i32
    %c0_i32_1 = arith.constant 0 : i32
    %c0_i32_2 = arith.constant 0 : i32
    return %arg0, %c0_i32, %c0_i32_0, %c0_i32_1 : i32, i32, i32, i32
  }
}

</mosaic_0001>

<bundles_post_ra>
// kernel: tpu_custom_call.1
= control target key start
LH: loop header
LB: loop body
LE: loop exit
PB: predicated region body
PF: predicated region fallthrough
CT: control target
= control target key end

     0   :  { %s3296_s0 = inlined_call_operand.hbm [shape: f32[2,8,128], index: 0, kind: input, shape index: {}]   ;;  %s3297_s1 = inlined_call_operand.vmem [shape: bf16[2,4,8,24], index: 1, kind: input, shape index: {}]   ;;  %s3298_s2 = inlined_call_operand.vmem [shape: f32[2,7,8,1], index: 2, kind: input, shape index: {}]   ;;  %s3299_s3 = inlined_call_operand.vmem [shape: f32[2,6,8,128], index: 3, kind: input, shape index: {}]   ;;  %s3300_s4 = inlined_call_operand.hbm [shape: f32[2,8,128], index: 4, kind: output, shape index: {0}]   ;;  %s3301_s5 = inlined_call_operand.vmem [shape: f32[16,2,8,8], index: 5, kind: output, shape index: {1}]  }
   0x1   :  { %3330 = sst [smem:[#allocation17_spill]] %s3296_s0 }
   0x2   :  { %11 = vsyncpa [#allocation4], 0 }
   0x3   :  { %13 = vsyncpa [#allocation4 + $0x1], 0 }
   0x4   :  { %14 = vsyncpa [#allocation5], 0 }
   0x5   :  { %16 = vsyncpa [#allocation5 + $0x1], 0  ;;  %s2467_s18 = smov 0   ;;  %s2469_s19 = smov 0  }
   0x6   :  { %s2471_s20 = smov 0   ;;  %s2473_s21 = smov 0  }
   0x7   :  { %s2475_s22 = smov 0   ;;  %s2477_s23 = smov 0  }
   0x8   :  { %s2479_s24 = smov 0   ;;  %s2481_s25 = smov 0  }
   0x9 LB: > { %3331 = sst [smem:[#allocation9_spill]] %s2399_s19  ;;  %s1959_s26 = sadd.s32 4294967295, %s2423_s25   ;;  %s2423_s25 = sphi %s2481_s25, %s22_s25   ;;  %s2419_s24 = sphi %s2479_s24, %s3427_s24   ;;  %s2415_s23 = sphi %s2477_s23, %s3426_s23   ;;  %s2411_s22 = sphi %s2475_s22, %s3425_s22   ;;  %s2407_s21 = sphi %s2473_s21, %s3424_s21   ;;  %s2403_s20 = sphi %s2471_s20, %s3423_s20   ;;  %s2399_s19 = sphi %s2469_s19, %s3422_s19   ;;  %s2395_s18 = sphi %s2467_s18, %s3421_s18  }
   0xa   : > { %3332 = sst [smem:[#allocation10_spill]] %s2403_s20  ;;  %s1960_s27 = sadd.s32 4294967294, %s2423_s25  }
   0xb   : > { %3333 = sst [smem:[#allocation11_spill]] %s2415_s23  ;;  %s31_s28 = sadd.s32 1, %s2415_s23 }
   0xc   : > { %3334 = sst [smem:[#allocation12_spill]] %s2419_s24  ;;  %s34_s29 = sadd.s32 1, %s2419_s24 }
   0xd   : > { %p32_p0 = scmp.ge.s32.totalorder %s31_s28, 2  ;;  %s41_s30 = sadd.s32 1, %s2403_s20 }
   0xe   : > { %p48_p1 = scmp.ne.s32.totalorder %s2403_s20, %s2399_s19  ;;  %p49_p2 = scmp.eq.s32.totalorder %s2423_s25, 0 }
   0xf   : > { %s3429_s28 = smov (%p32_p0, %s31_s28), 0  ;;  %s3431_s29 = smov (!%p32_p0, %s34_s29), %s2419_s24 }
  0x10   : > { %3335 = sst [smem:[#allocation13_spill]] %s3429_s28  ;;  %p2518_p3 = por %p49_p2, %p48_p1 }
  0x11   : > { %p54_p4 = scmp.ne.s32.totalorder %s2399_s19, %s2395_s18  ;;  %p36_p5 = scmp.ge.s32.totalorder %s3431_s29, 2 }
  0x12   : > { %p55_p6 = scmp.eq.s32.totalorder %s1959_s26, 0  ;;  %p156_p7 = scmp.eq.s32.totalorder %s1959_s26, 3 }
  0x13   : > { %p162_p8 = scmp.eq.s32.totalorder %s1960_s27, 3  ;;  %s3433_s29 = smov (%p36_p5, %s3431_s29), 0 }
  0x14   : > { %3337 = sst [smem:[#allocation14_spill]] %s3433_s29  ;;  %p2526_p9 = por %p55_p6, %p54_p4 }
  0x15   : > { %p2530_p10 = por %p156_p7, %p48_p1  ;;  %s38_s9 = ssub.s32 %s2419_s24, %s3433_s29 }
  0x16   : > { %p2536_p11 = por %p162_p8, %p54_p4  ;;  %p39_p12 = scmp.eq.s32.totalorder %s38_s9, 0 }
  0x17   : > { %p2176_p13 = scmp.lt.s32.totalorder %s2423_s25, 4  ;;  %s208_s11 = sand.u32 1, %s2403_s20  }
  0x18   : > { %s3340_s10 = scalar_select %p2536_p11, 1, 0 }
  0x19   : > { %s2543_s12 = scalar_select %p39_p12, %s2403_s20, %s41_s30  }
  0x1a   : > { %3341 = sst [smem:[#allocation15_spill]] %s3340_s10  ;;  %s1963_s13 = sshll.u32 %s208_s11, 3 }
  0x1b   : > { %3342 = sst [smem:[#allocation16_spill]] %s2543_s12  ;;  %s1964_s14 = sshll.u32 %s2419_s24, 3 }
  0x1c   : > { %s3343_s0 = sld [smem:[#allocation17_spill]]  ;;  %s212_s26 = scalar_lea.vmem [#allocation3], %s1963_s13 }
  0x1d   : > { %s220_s27 = sshll.u32 %s212_s26, 4  ;;  %p2169_p0 = pnand %p2176_p13, %p2518_p3  ;;  %s221_s27 = int_to_ptr.vmem [resolvable:$true] %s220_s27 }
  0x1e   : > { %p1965_p1 = scmp.ge.s32.totalorder %s2423_s25, 1  ;;  %p249_p2 = scmp.lt.s32.totalorder %s2423_s25, 5 }
  0x1f   : > { %s209_s9 = scalar_lea.sflag [#allocation4], %s208_s11 }
  0x20   : > { %p250_p4 = pnand %p1965_p1, %p249_p2 }
  0x21   : > { %s2554_s30 = sand.u32 (!%p250_p4), 1, %s2399_s19  }
  0x22   : > { %s216_s17 = scalar_lea.hbm %s3343_s0, %s1964_s14  ;;  %253 = sbr.rel (%p250_p4) target bundleno = 3413 (0xd55), region = 36 }
  0x23   : > { %s218_s28 = sshll.u32 %s216_s17, 4  ;;  %s1966_s14 = sshll.u32 (!%p250_p4), %s2554_s30, 3  ;;  %s219_s28 = int_to_ptr.hbm [resolvable:$true] %s218_s28 }
  0x24   : > { %2171 = dma.hbm_to_vmem [thread:$0]  (!%p2169_p0), %s219_s28, 128, %s221_s27, %s209_s9  }
  0x25   : > { %s256_s13 = scalar_lea.sflag (!%p250_p4), [#allocation4], %s2554_s30  ;;  %s259_s15 = scalar_lea.vmem (!%p250_p4), [#allocation3], %s1966_s14 }
  0x27   : > { %2386 = dma.done.wait (%p2526_p9), %s256_s13, 128  }
  0x28   : > { %2388 = vsyncadd (%p2526_p9), %s256_s13, 4294967168  ;;  %p308_p3 = scmp.lt.s32.totalorder %s2407_s21, 1  ;;  %s2564_s28 = sshll.u32 %s2411_s22, 3 }
  0x29   : > { %p324_p5 = scmp.lt.s32.totalorder %s2564_s28, 15  ;;  %p1975_p6 = scmp.ne.s32.totalorder %s2407_s21, 0 }
  0x2a   : > { %s309_s6 = scalar_select %p308_p3, %s2407_s21, 1 }
  0x2b   : > { %s325_s23 = scalar_select %p324_p5, %s2564_s28, 15 }
  0x2c   : > { %s2160_s11 = sshll.u32 %s309_s6, 4  ;;  %s2162_s16 = smul.u32 56, %s309_s6 }
  0x2d   : > { %s2571_s27 = scalar_lea.vmem %s3297_s1, %s2160_s11  ;;  %s2163_s9 = smul.u32 48, %s309_s6 }
  0x2e   : > { %s2576_s0 = scalar_lea.vmem %s3298_s2, %s2162_s16  ;;  %s2161_s12 = sshll.u32 %s325_s23, 4 }
  0x2f   : > { %s2581_s24 = scalar_lea.vmem %s3299_s3, %s2163_s9  ;;  %s2587_s10 = scalar_lea.vmem %s3301_s5, %s2161_s12 }
  0x30   : > { %s2589_s11 = scalar_lea.vmem [#allocation6], %s1966_s14  ;;  %334 = sbr.rel (%p1975_p6) target bundleno = 55 (0x37), region = 44 }
  0x35   : > { %v335_v0 = vld [vmem:[%s259_s15] sm:$0xff] }
  0x36   : > { %336 = vst [vmem:[%s2589_s11] sm:$0xff] %v335_v0 }
  0x37 PF: > { %v1992_v1 = vld [vmem:[%s2576_s0 + $0x8] sm:$0xff]  ;;  %v2425_v2 = vmov 0   ;;  %v439_v3 = vld [vmem:[%s2576_s0] sm:$0xff]  ;;  %v1993_v4 = vld [vmem:[%s2576_s0 + $0x10] sm:$0xff]  ;;  %vm456_vm0 = vcmask 130048   ;;  %s2426_s19 = smov 112   ;;  %s1784_s26 = scalar_lea.hbm %s3300_s4, %s2564_s28 }
  0x38   : > { %2254 = vset.pattern.permute.xlu0 %v2425_v2  ;;  %2255 = vset.pattern.permute.xlu1 %v2425_v2  ;;  %s2427_s20 = smov 96   ;;  %s2428_s23 = smov 64   ;;  %vm3308_vm1 = vcmask 64512  }
  0x39   : > { %452 = vperm.xlu0 %2254, %v1992_v1   ;;  %2256 = vset.pattern.permute.xlu2 %v2425_v2  ;;  %s2429_s29 = smov 80   ;;  %s2430_s12 = smov 16  }
  0x3a   : > { %s2431_s14 = smov 48   ;;  %s2432_s15 = smov 32  }
  0x3b   : > { %s1997_s6 = sshll.u32 %s2407_s21, 3  ;;  %s2434_s21 = smov 120  }
  0x3c   : > { %s2662_s16 = scalar_lea.vmem %s2587_s10, %s1997_s6  ;;  %s2435_s10 = smov 127  }
  0x3d   : > { %v2597_v5 = vld [vmem:[%s2589_s11] sm:$0xff]  ;;  %s2436_s17 = smov 1   ;;  %s1788_s9 = sshll.u32 %s1784_s26, 4  ;;  %s1789_s9 = int_to_ptr.hbm [resolvable:$true] %s1788_s9 }
  0x3e   : > { %s1768_s7 = scalar_lea.sflag [#allocation5], %s2554_s30  ;;  %s2339_s13 = sshra.s32 %s1789_s9, 4  ;;  %s2340_s13 = int_to_ptr.hbm [resolvable:$true] %s2339_s13 }
  0x3f   : > { %s2341_s22 = scalar_lea.hbm %s2340_s13, 8  ;;  %s2345_s28 = scalar_lea.hbm %s3300_s4, 16 }
  0x40   : > { %p2342_p7 = scmp.ne.s32.totalorder %s2340_s13, %s2341_s22  ;;  %p2346_p12 = scmp.lt.s32.totalorder %s2340_s13, %s3300_s4 }
  0x41   : > { %446 = vperm.xlu0 %2254, %v439_v3   ;;  %p2347_p13 = scmp.lt.s32.totalorder %s2345_s28, %s2341_s22 }
  0x42   : > { %p2343_p8 = pnand %p2342_p7, %p2530_p10 }
  0x43   : > { %p2348_p0 = por %p2347_p13, %p2346_p12 }
  0x44   : > { %p2344_p9 = pneg %p2343_p8 }
  0x46   : > { %p2349_p1 = pnand %p2348_p0, %p2344_p9 }
  0x49   : > { %510 = vperm.xlu0 %2254, %v1993_v4  }
  0xab   : > { %v453_v6 = vpop.permute.xlu0 %452 }
  0xac   : > { %v2600_v7 = vmul.f32 %v453_v6, %v2597_v5 }
  0xae   : > { %543 = vrot.lane.b32.xlu2 %v2600_v7, %s2426_s19  ;;  %1994 = vmatpush.xpose.msk.msra.mxu0 %vm456_vm0, %v2600_v7 }
  0xb3   : > { %v447_v8 = vpop.permute.xlu0 %446 }
  0xb4   : > { %v449_v9 = vmul.f32 %v447_v8, %v2597_v5 }
  0xb6   : > { %629 = vrot.lane.b32.xlu0 %v449_v9, %s2427_s20  ;;  %541 = vrot.lane.b32.xlu2 %v449_v9, %s2426_s19 }
  0xb7   : > { %1995 = vmatmul.msk.f32.vlgmr.msra.gmra.mxu0 %vm456_vm0, %v449_v9 }
  0xbb   : > { %v511_v10 = vpop.permute.xlu0 %510 }
  0xbc   : > { %v2611_v11 = vmul.f32 %v511_v10, %v2597_v5 }
  0xbe   : > { %532 = vmatpush.msra.mxu1 %v2611_v11  ;;  %805 = vrot.lane.b32.xlu0 %v2600_v7, %s2428_s23 }
  0xbf   : > { %718 = vrot.lane.b32.xlu2 %v2600_v7, %s2429_s29 }
  0xc6   : > { %803 = vrot.lane.b32.xlu0 %v449_v9, %s2428_s23 }
  0xc7   : > { %716 = vrot.lane.b32.xlu2 %v449_v9, %s2429_s29 }
  0xce   : > { %1066 = vrot.lane.b32.xlu0 %v2600_v7, %s2430_s12 }
  0xcf   : > { %892 = vrot.lane.b32.xlu2 %v2600_v7, %s2431_s14 }
  0xd7   : > { %890 = vrot.lane.b32.xlu2 %v449_v9, %s2431_s14 }
  0xdf   : > { %977 = vrot.lane.b32.xlu2 %v449_v9, %s2432_s15 }
 0x108   : > { %v544_v12 = vpop.permute.xlu2 %543 }
 0x109   : > { %1998 = vmatpush.xpose.msk.msra.mxu2 %vm456_vm0, %v544_v12 }
 0x110   : > { %v542_v13 = vpop.permute.xlu2 %541 }
 0x111   : > { %1999 = vmatmul.msk.f32.vlgmr.msra.gmra.mxu2 %vm456_vm0, %v542_v13 }
 0x119   : > { %v719_v14 = vpop.permute.xlu2 %718 }
 0x11a   : > { %2008 = vmatpush.xpose.msk.msrb.mxu0 %vm456_vm0, %v719_v14 }
 0x121   : > { %v717_v15 = vpop.permute.xlu2 %716 }
 0x122   : > { %2009 = vmatmul.msk.f32.vlgmr.msrb.gmra.mxu0 %vm456_vm0, %v717_v15 }
 0x128   : > { %v2630_v16 = vpop.permute.xlu0 %629 }
 0x129   : > { %v893_v17 = vpop.permute.xlu2 %892 }
 0x12a   : > { %2018 = vmatpush.xpose.msk.msra.mxu0 %vm456_vm0, %v893_v17 }
 0x130   : > { %v2633_v18 = vpop.permute.xlu0 %805 }
 0x131   : > { %v891_v19 = vpop.permute.xlu2 %890 }
 0x132   : > { %2019 = vmatmul.msk.f32.vlgmr.msra.gmra.mxu0 %vm456_vm0, %v891_v19 }
 0x134   : > { %v480_v20 = vpop.f32.mrf.mxu0 }
 0x135   : > { %v484_v21 = vsel %vm3308_vm1, %v480_v20, -inf }
 0x136   : > { %485 = vmax.xlane.f32.xlu1 %v484_v21 }
 0x138   : > { %v2637_v22 = vpop.permute.xlu0 %803 }
 0x139   : > { %v978_v60 = vpop.permute.xlu2 %977 }
 0x140   : > { %v1067_v23 = vpop.permute.xlu0 %1066 }
 0x141   : > { %2028 = vmatpush.xpose.msk.msrb.mxu0 %vm456_vm0, %v1067_v23 }
 0x14f   : > { %631 = vrot.lane.b32.xlu1 %v2600_v7, %s2427_s20 }
 0x194   : > { %v566_v24 = vpop.f32.mrf.mxu2 }
 0x195   : > { %v569_v25 = vsel %vm3308_vm1, %v566_v24, -inf }
 0x196   : > { %570 = vmax.xlane.f32.xlu0 %v569_v25 }
 0x19f   : > { %v2643_v26 = vpop.f32.mrf.mxu0 }
 0x1a0   : > { %v744_v35 = vsel %vm3308_vm1, %v2643_v26, -inf }
 0x1a9   : > { %v486_v27 = vpop.xlane.xlu1 %485 }
 0x1aa   : > { %v487_v28 = vsub.f32 %v480_v20, %v486_v27 }
 0x1ac   : > { %v488_v29 = vmul.f32 1.442695, %v487_v28 }
 0x1ae   : > { %2257 = vpow2.f32 %v488_v29 }
 0x1af   : > { %v915_v30 = vpop.f32.mrf.mxu0 }
 0x1b0   : > { %v918_v31 = vsel %vm3308_vm1, %v915_v30, -inf }
 0x1b1   : > { %919 = vmax.xlane.f32.xlu0 %v918_v31 }
 0x1b4   : > { %v2258_v32 = vpop.eup %2257 }
 0x1b5   : > { %v490_v33 = vsel %vm3308_vm1, %v2258_v32, 0.0 }
 0x1b6   : > { %491 = vadd.xlane.f32.xlu1 %v490_v33 }
 0x1c1   : > { %v632_v34 = vpop.permute.xlu1 %631 }
 0x1c2   : > { %2003 = vmatpush.xpose.msk.msrb.mxu1 %vm456_vm0, %v632_v34 }
 0x1cf   : > { %979 = vrot.lane.b32.xlu1 %v2600_v7, %s2432_s15 }
 0x1d7   : > { %1064 = vrot.lane.b32.xlu1 %v449_v9, %s2430_s12 }
 0x201   : > { %745 = vmax.xlane.f32.xlu1 %v744_v35 }
 0x209   : > { %v571_v36 = vpop.xlane.xlu0 %570 }
 0x20a   : > { %v572_v37 = vsub.f32 %v566_v24, %v571_v36 }
 0x20c   : > { %v573_v38 = vmul.f32 1.442695, %v572_v37 }
 0x20e   : > { %2259 = vpow2.f32 %v573_v38 }
 0x214   : > { %v2260_v39 = vpop.eup %2259 }
 0x215   : > { %v575_v40 = vsel %vm3308_vm1, %v2260_v39, 0.0 }
 0x216   : > { %576 = vadd.xlane.f32.xlu0 %v575_v40 }
 0x224   : > { %v920_v41 = vpop.xlane.xlu0 %919 }
 0x225   : > { %v921_v42 = vsub.f32 %v915_v30, %v920_v41 }
 0x227   : > { %v922_v43 = vmul.f32 1.442695, %v921_v42 }
 0x229   : > { %2261 = vpow2.f32 %v922_v43  ;;  %v492_v44 = vpop.xlane.xlu1 %491 }
 0x22a   : > { %2263 = vrcp.f32 %v492_v44  ;;  %681 = vrot.lane.b32.xlu0 %v2611_v11, %s2427_s20  ;;  %v504_v50 = vand.u32 2147483648, %v492_v44  ;;  %v502_v52 = vand.u32 2147483647, %v492_v44  ;;  %vm498_vm3 = vweird.f32 %v492_v44 }
 0x22c   : > { %v505_v54 = vor.u32 1.1754944e-38, %v504_v50  ;;  %vm503_vm5 = vcmp.eq.f32.partialorder %v502_v52, 8.507059e+37 }
 0x22f   : > { %v2656_v45 = vpop.eup %2261 }
 0x230   : > { %v2264_v46 = vpop.eup %2263  ;;  %v924_v47 = vsel %vm3308_vm1, %v2656_v45, 0.0 }
 0x231   : > { %v494_v48 = vmul.f32 %v2264_v46, %v492_v44  ;;  %925 = vadd.xlane.f32.xlu1 %v924_v47  ;;  %vm499_vm2 = vweird.f32 %v2264_v46 }
 0x232   : > { %vm500_vm4 = vmor %vm498_vm3, %vm499_vm2 }
 0x233   : > { %v495_v49 = vsub.f32 1.0, %v494_v48 }
 0x235   : > { %v496_v51 = vmul.f32 %v2264_v46, %v495_v49 }
 0x237   : > { %v497_v53 = vadd.f32 %v2264_v46, %v496_v51 }
 0x239   : > { %v501_v55 = vsel %vm500_vm4, %v2264_v46, %v497_v53 }
 0x23a   : > { %v506_v56 = vsel %vm503_vm5, %v505_v54, %v501_v55 }
 0x23b   : > { %v507_v57 = vmul.f32 %v2258_v32, %v506_v56 }
 0x23d   : > { %1996 = vmatmul.msk.f32.vlgmr.msra.gmra.mxu1 %vm3308_vm1, %v507_v57  ;;  %540 = vst.msk [vmem:[%s2662_s16] sm:$0xff] %vm3308_vm1, %v507_v57 }
 0x23e   : > { %2013 = vmatpush.xpose.msk.msra.mxu1 %vm456_vm0, %v2633_v18 }
 0x241   : > { %v980_v58 = vpop.permute.xlu1 %979 }
 0x245   : > { %2004 = vmatmul.msk.f32.vlgmr.msrb.gmra.mxu1 %vm456_vm0, %v2630_v16 }
 0x246   : > { %2023 = vmatpush.xpose.msk.msrb.mxu1 %vm456_vm0, %v980_v58 }
 0x249   : > { %v1065_v59 = vpop.permute.xlu1 %1064 }
 0x24a   : > { %2029 = vmatmul.msk.f32.vlgmr.msrb.gmra.mxu0 %vm456_vm0, %v1065_v59 }
 0x24d   : > { %2014 = vmatmul.msk.f32.vlgmr.msra.gmra.mxu1 %vm456_vm0, %v2637_v22 }
 0x255   : > { %2024 = vmatmul.msk.f32.vlgmr.msrb.gmra.mxu1 %vm456_vm0, %v978_v60 }
 0x274   : > { %v746_v10 = vpop.xlane.xlu1 %745 }
 0x275   : > { %v747_v28 = vsub.f32 %v2643_v26, %v746_v10 }
 0x277   : > { %v748_v31 = vmul.f32 1.442695, %v747_v28 }
 0x289   : > { %v577_v61 = vpop.xlane.xlu0 %576 }
 0x28a   : > { %2265 = vrcp.f32 %v577_v61  ;;  %v589_v1 = vand.u32 2147483648, %v577_v61  ;;  %v587_v3 = vand.u32 2147483647, %v577_v61  ;;  %vm583_vm7 = vweird.f32 %v577_v61 }
 0x28c   : > { %v590_v6 = vor.u32 1.1754944e-38, %v589_v1  ;;  %vm588_vm9 = vcmp.eq.f32.partialorder %v587_v3, 8.507059e+37 }
 0x290   : > { %v2266_v62 = vpop.eup %2265 }
 0x291   : > { %v579_v63 = vmul.f32 %v2266_v62, %v577_v61  ;;  %vm584_vm6 = vweird.f32 %v2266_v62 }
 0x292   : > { %vm585_vm8 = vmor %vm583_vm7, %vm584_vm6 }
 0x293   : > { %v580_v0 = vsub.f32 1.0, %v579_v63 }
 0x295   : > { %v581_v2 = vmul.f32 %v2266_v62, %v580_v0 }
 0x297   : > { %v582_v4 = vadd.f32 %v2266_v62, %v581_v2 }
 0x299   : > { %v586_v7 = vsel %vm585_vm8, %v2266_v62, %v582_v4 }
 0x29a   : > { %v591_v8 = vsel %vm588_vm9, %v590_v6, %v586_v7 }
 0x29b   : > { %v2676_v9 = vmul.f32 %v2260_v39, %v591_v8 }
 0x29c   : > { %v682_v51 = vpop.permute.xlu0 %681 }
 0x29d   : > { %2002 = vst.msk [vmem:[%s2662_s16 + $0x10] sm:$0xff] %vm3308_vm1, %v2676_v9 }
 0x2a4   : > { %v926_v12 = vpop.xlane.xlu1 %925 }
 0x2a5   : > { %2267 = vrcp.f32 %v926_v12  ;;  %v938_v16 = vand.u32 2147483648, %v926_v12  ;;  %v936_v18 = vand.u32 2147483647, %v926_v12  ;;  %vm932_vm11 = vweird.f32 %v926_v12 }
 0x2a6   : > { %2269 = vpow2.f32 %v748_v31 }
 0x2a7   : > { %v939_v20 = vor.u32 1.1754944e-38, %v938_v16  ;;  %vm937_vm13 = vcmp.eq.f32.partialorder %v936_v18, 8.507059e+37 }
 0x2ab   : > { %v2268_v13 = vpop.eup %2267 }
 0x2ac   : > { %v928_v14 = vmul.f32 %v2268_v13, %v926_v12  ;;  %vm933_vm10 = vweird.f32 %v2268_v13  ;;  %v2270_v34 = vpop.eup %2269 }
 0x2ad   : > { %vm934_vm12 = vmor %vm932_vm11, %vm933_vm10  ;;  %v750_v35 = vsel %vm3308_vm1, %v2270_v34, 0.0 }
 0x2ae   : > { %v929_v15 = vsub.f32 1.0, %v928_v14 }
 0x2b0   : > { %v930_v17 = vmul.f32 %v2268_v13, %v929_v15 }
 0x2b2   : > { %v931_v19 = vadd.f32 %v2268_v13, %v930_v17 }
 0x2b4   : > { %v935_v21 = vsel %vm934_vm12, %v2268_v13, %v931_v19 }
 0x2b5   : > { %v940_v22 = vsel %vm937_vm13, %v939_v20, %v935_v21 }
 0x2b6   : > { %v2682_v23 = vmul.f32 %v2656_v45, %v940_v22 }
 0x2b8   : > { %2022 = vst.msk [vmem:[%s2662_s16 + $0x50] sm:$0xff] %vm3308_vm1, %v2682_v23 }
 0x2ba   : > { %v534_v24 = vpop.f32.mrf.mxu1 }
 0x2bb   : > { %537 = vst.msk [vmem:[#allocation2] sm:$0xff] %vm456_vm0, %v534_v24 }
 0x2c2   : > { %v2688_v25 = vpop.f32.mrf.mxu1 }
 0x2c3   : > { %v657_v27 = vsel %vm3308_vm1, %v2688_v25, -inf }
 0x2c4   : > { %658 = vmax.xlane.f32.xlu2 %v657_v27 }
 0x2c7   : > { %v1089_v32 = vpop.f32.mrf.mxu0 }
 0x2c8   : > { %v1092_v33 = vsel %vm3308_vm1, %v1089_v32, -inf }
 0x2ca   : > { %v828_v29 = vpop.f32.mrf.mxu1 }
 0x2cb   : > { %v831_v30 = vsel %vm3308_vm1, %v828_v29, -inf }
 0x2cc   : > { %832 = vmax.xlane.f32.xlu2 %v831_v30 }
 0x2d2   : > { %v1002_v50 = vpop.f32.mrf.mxu1 }
 0x2d3   : > { %v1005_v56 = vsel %vm3308_vm1, %v1002_v50, -inf }
 0x2d4   : > { %1093 = vmax.xlane.f32.xlu2 %v1092_v33 }
 0x2dc   : > { %751 = vadd.xlane.f32.xlu2 %v750_v35 }
 0x2f4   : > { %594 = vrot.lane.b32.xlu2 %v2611_v11, %s2426_s19 }
 0x2fc   : > { %855 = vrot.lane.b32.xlu2 %v2611_v11, %s2428_s23 }
 0x304   : > { %1029 = vrot.lane.b32.xlu2 %v2611_v11, %s2432_s15 }
 0x337   : > { %v659_v26 = vpop.xlane.xlu2 %658 }
 0x338   : > { %v660_v63 = vsub.f32 %v2688_v25, %v659_v26 }
 0x33a   : > { %v661_v0 = vmul.f32 1.442695, %v660_v63 }
 0x33f   : > { %v833_v36 = vpop.xlane.xlu2 %832 }
 0x340   : > { %v834_v37 = vsub.f32 %v828_v29, %v833_v36 }
 0x342   : > { %v835_v38 = vmul.f32 1.442695, %v834_v37 }
 0x344   : > { %2271 = vpow2.f32 %v835_v38 }
 0x347   : > { %v1094_v39 = vpop.xlane.xlu2 %1093 }
 0x348   : > { %v1095_v40 = vsub.f32 %v1089_v32, %v1094_v39 }
 0x34a   : > { %v2702_v41 = vpop.eup %2271  ;;  %v1096_v42 = vmul.f32 1.442695, %v1095_v40 }
 0x34b   : > { %v837_v43 = vsel %vm3308_vm1, %v2702_v41, 0.0 }
 0x34c   : > { %2273 = vpow2.f32 %v1096_v42  ;;  %838 = vadd.xlane.f32.xlu0 %v837_v43 }
 0x34f   : > { %v752_v44 = vpop.xlane.xlu2 %751 }
 0x350   : > { %2275 = vrcp.f32 %v752_v44  ;;  %v764_v53 = vand.u32 2147483648, %v752_v44  ;;  %v762_v55 = vand.u32 2147483647, %v752_v44  ;;  %vm758_vm15 = vweird.f32 %v752_v44 }
 0x351   : > { %2277 = vpow2.f32 %v661_v0 }
 0x352   : > { %v2706_v45 = vpop.eup %2273  ;;  %v765_v58 = vor.u32 1.1754944e-38, %v764_v53  ;;  %vm763_vm2 = vcmp.eq.f32.partialorder %v762_v55, 8.507059e+37 }
 0x353   : > { %v1098_v46 = vsel %vm3308_vm1, %v2706_v45, 0.0 }
 0x354   : > { %1099 = vadd.xlane.f32.xlu1 %v1098_v46 }
 0x356   : > { %v2276_v47 = vpop.eup %2275 }
 0x357   : > { %v754_v48 = vmul.f32 %v2276_v47, %v752_v44  ;;  %v595_v49 = vpop.permute.xlu2 %594  ;;  %vm759_vm14 = vweird.f32 %v2276_v47  ;;  %v2718_v1 = vpop.eup %2277 }
 0x358   : > { %615 = vmatpush.msra.mxu3 %v595_v49  ;;  %vm760_vm0 = vmor %vm758_vm15, %vm759_vm14  ;;  %v663_v2 = vsel %vm3308_vm1, %v2718_v1, 0.0 }
 0x359   : > { %v755_v52 = vsub.f32 1.0, %v754_v48  ;;  %2000 = vmatmul.msk.f32.vlgmr.msra.gmra.mxu3 %vm3308_vm1, %v2676_v9 }
 0x35a   : > { %702 = vmatpush.msrb.mxu3 %v682_v51 }
 0x35b   : > { %v756_v54 = vmul.f32 %v2276_v47, %v755_v52 }
 0x35c   : > { %1006 = vmax.xlane.f32.xlu1 %v1005_v56 }
 0x35d   : > { %v757_v57 = vadd.f32 %v2276_v47, %v756_v54 }
 0x35f   : > { %v856_v59 = vpop.permute.xlu2 %855  ;;  %v761_v60 = vsel %vm760_vm0, %v2276_v47, %v757_v57 }
 0x360   : > { %876 = vmatpush.msra.mxu3 %v856_v59  ;;  %v766_v61 = vsel %vm763_vm2, %v765_v58, %v761_v60 }
 0x361   : > { %v767_v62 = vmul.f32 %v2270_v34, %v766_v61 }
 0x363   : > { %2012 = vst.msk [vmem:[%s2662_s16 + $0x30] sm:$0xff] %vm3308_vm1, %v767_v62 }
 0x367   : > { %v1030_v48 = vpop.permute.xlu2 %1029 }
 0x375   : > { %768 = vrot.lane.b32.xlu1 %v2611_v11, %s2429_s29 }
 0x39f   : > { %664 = vadd.xlane.f32.xlu1 %v663_v2 }
 0x3b8   : > { %1116 = vrot.lane.b32.xlu1 %v2611_v11, %s2430_s12 }
 0x3bf   : > { %v839_v3 = vpop.xlane.xlu0 %838 }
 0x3c0   : > { %2279 = vrcp.f32 %v839_v3  ;;  %v851_v9 = vand.u32 2147483648, %v839_v3  ;;  %v849_v12 = vand.u32 2147483647, %v839_v3  ;;  %vm845_vm4 = vweird.f32 %v839_v3 }
 0x3c2   : > { %v852_v15 = vor.u32 1.1754944e-38, %v851_v9  ;;  %vm850_vm6 = vcmp.eq.f32.partialorder %v849_v12, 8.507059e+37 }
 0x3c6   : > { %v2280_v4 = vpop.eup %2279 }
 0x3c7   : > { %v841_v6 = vmul.f32 %v2280_v4, %v839_v3  ;;  %v1100_v7 = vpop.xlane.xlu1 %1099  ;;  %vm846_vm3 = vweird.f32 %v2280_v4 }
 0x3c8   : > { %2281 = vrcp.f32 %v1100_v7  ;;  %vm847_vm5 = vmor %vm845_vm4, %vm846_vm3  ;;  %v1112_v24 = vand.u32 2147483648, %v1100_v7  ;;  %v1110_v28 = vand.u32 2147483647, %v1100_v7  ;;  %vm1106_vm8 = vweird.f32 %v1100_v7 }
 0x3c9   : > { %v842_v8 = vsub.f32 1.0, %v841_v6  ;;  %vm624_vm4 = vcmask 261248  }
 0x3ca   : > { %v1113_v30 = vor.u32 1.1754944e-38, %v1112_v24  ;;  %vm1111_vm10 = vcmp.eq.f32.partialorder %v1110_v28, 8.507059e+37 }
 0x3cb   : > { %v843_v10 = vmul.f32 %v2280_v4, %v842_v8  ;;  %v338_v8 = vlaneseq }
 0x3cd   : > { %v844_v13 = vadd.f32 %v2280_v4, %v843_v10  ;;  %v339_v10 = vand.u32 127, %v338_v8  ;;  %v2752_v12 = vshrl.u32 %v338_v8, 7 }
 0x3ce   : > { %v2282_v14 = vpop.eup %2281 }
 0x3cf   : > { %v848_v16 = vsel %vm847_vm5, %v2280_v4, %v844_v13  ;;  %v1102_v17 = vmul.f32 %v2282_v14, %v1100_v7  ;;  %v1007_v18 = vpop.xlane.xlu1 %1006  ;;  %vm1107_vm7 = vweird.f32 %v2282_v14  ;;  %vm711_vm5 = vcmask 392448  }
 0x3d0   : > { %v853_v19 = vsel %vm850_vm6, %v852_v15, %v848_v16  ;;  %v1008_v20 = vsub.f32 %v1002_v50, %v1007_v18  ;;  %vm1108_vm9 = vmor %vm1106_vm8, %vm1107_vm7  ;;  %vm798_vm6 = vcmask 523648   ;;  %vm885_vm7 = vcmask 654848  }
 0x3d1   : > { %v1103_v21 = vsub.f32 1.0, %v1102_v17  ;;  %v854_v22 = vmul.f32 %v2702_v41, %v853_v19  ;;  %v2754_v13 = vand.u32 15, %v339_v10  ;;  %v356_v15 = vadd.s32 112, %v2752_v12 }
 0x3d2   : > { %v1009_v25 = vmul.f32 1.442695, %v1008_v20  ;;  %v355_v16 = vadd.s32 104, %v2752_v12  ;;  %v354_v17 = vadd.s32 96, %v2752_v12  ;;  %v353_v18 = vadd.s32 88, %v2752_v12 }
 0x3d3   : > { %v1104_v27 = vmul.f32 %v2282_v14, %v1103_v21  ;;  %2017 = vst.msk [vmem:[%s2662_s16 + $0x40] sm:$0xff] %vm3308_vm1, %v854_v22  ;;  %v352_v19 = vadd.s32 80, %v2752_v12  ;;  %v2763_v21 = vsub.s32 %v339_v10, %v2754_v13 }
 0x3d4   : > { %2283 = vpow2.f32 %v1009_v25  ;;  %v371_v24 = vand.u32 15, %v355_v16  ;;  %v370_v25 = vand.u32 15, %v354_v17 }
 0x3d5   : > { %v1105_v29 = vadd.f32 %v2282_v14, %v1104_v27 }
 0x3d7   : > { %v1109_v31 = vsel %vm1108_vm9, %v2282_v14, %v1105_v29  ;;  %v357_v14 = vadd.s32 120, %v2752_v12  ;;  %v387_v29 = vsub.s32 %v355_v16, %v371_v24  ;;  %v3370_v16 = vmov 0 }
 0x3d8   : > { %v1114_v32 = vsel %vm1111_vm10, %v1113_v30, %v1109_v31  ;;  %v369_v30 = vand.u32 15, %v353_v18  ;;  %v3344_v31 = vmov 0 }
 0x3d9   : > { %v1115_v33 = vmul.f32 %v2706_v45, %v1114_v32  ;;  %v373_v20 = vand.u32 15, %v357_v14  ;;  %vm2782_vm10 = vcmp.eq.s32.totalorder %v387_v29, %v2763_v21 }
 0x3da   : > { %v2284_v34 = vpop.eup %2283 }
 0x3db   : > { %v1011_v35 = vsel %vm3308_vm1, %v2284_v34, 0.0  ;;  %2032 = vst.msk [vmem:[%s2662_s16 + $0x70] sm:$0xff] %vm3308_vm1, %v1115_v33  ;;  %v389_v27 = vsub.s32 %v357_v14, %v373_v20 }
 0x3dc   : > { %1012 = vadd.xlane.f32.xlu0 %v1011_v35  ;;  %v617_v36 = vpop.f32.mrf.mxu3  ;;  %v2433_v35 = vmov 1.0  }
 0x3dd   : > { %vm2766_vm8 = vcmp.eq.s32.totalorder %v389_v27, %v2763_v21 }
 0x3de   : > { %v3345_v31 = vsel %vm2766_vm8, 4294967295, %v3344_v31  ;;  %2034 = vmatpush.msk.msra.mxu1 %vm2766_vm8, %v2433_v35 }
 0x3e7   : > { %v769_v26 = vpop.permute.xlu1 %768 }
 0x3e8   : > { %789 = vmatpush.msrb.mxu2 %v769_v26 }
 0x3e9   : > { %2010 = vmatmul.msk.f32.vlgmr.msrb.gmra.mxu2 %vm3308_vm1, %v767_v62 }
 0x3f0   : > { %942 = vrot.lane.b32.xlu0 %v2611_v11, %s2431_s14 }
 0x3f8   : > { %621 = vrot.lane.b32.xlu0 %v617_v36, %s2430_s12  ;;  %v385_v36 = vsub.s32 %v353_v18, %v369_v30 }
 0x412   : > { %v665_v37 = vpop.xlane.xlu1 %664 }
 0x413   : > { %2285 = vrcp.f32 %v665_v37  ;;  %v677_v41 = vand.u32 2147483648, %v665_v37  ;;  %v675_v43 = vand.u32 2147483647, %v665_v37  ;;  %vm671_vm12 = vweird.f32 %v665_v37 }
 0x415   : > { %v678_v45 = vor.u32 1.1754944e-38, %v677_v41  ;;  %vm676_vm14 = vcmp.eq.f32.partialorder %v675_v43, 8.507059e+37  ;;  %v350_v43 = vadd.s32 64, %v2752_v12 }
 0x419   : > { %v2286_v38 = vpop.eup %2285 }
 0x41a   : > { %v667_v39 = vmul.f32 %v2286_v38, %v665_v37  ;;  %vm672_vm11 = vweird.f32 %v2286_v38 }
 0x41b   : > { %vm673_vm13 = vmor %vm671_vm12, %vm672_vm11  ;;  %vm2804_vm12 = vcmp.eq.s32.totalorder %v385_v36, %v2763_v21 }
 0x41c   : > { %v668_v40 = vsub.f32 1.0, %v667_v39 }
 0x41e   : > { %v669_v42 = vmul.f32 %v2286_v38, %v668_v40  ;;  %v351_v40 = vadd.s32 72, %v2752_v12 }
 0x420   : > { %v670_v44 = vadd.f32 %v2286_v38, %v669_v42  ;;  %v367_v42 = vand.u32 15, %v351_v40 }
 0x422   : > { %v674_v46 = vsel %vm673_vm13, %v2286_v38, %v670_v44  ;;  %v383_v44 = vsub.s32 %v351_v40, %v367_v42 }
 0x423   : > { %v679_v11 = vsel %vm676_vm14, %v678_v45, %v674_v46  ;;  %v366_v45 = vand.u32 15, %v350_v43  ;;  %v349_v46 = vadd.s32 56, %v2752_v12 }
 0x424   : > { %v680_v47 = vmul.f32 %v2718_v1, %v679_v11  ;;  %vm2835_vm14 = vcmp.eq.s32.totalorder %v383_v44, %v2763_v21 }
 0x426   : > { %2005 = vmatmul.msk.f32.vlgmr.msrb.gmra.mxu3 %vm3308_vm1, %v680_v47  ;;  %2007 = vst.msk [vmem:[%s2662_s16 + $0x20] sm:$0xff] %vm3308_vm1, %v680_v47  ;;  %v382_v47 = vsub.s32 %v350_v43, %v366_v45 }
 0x427   : > { %1050 = vmatpush.msrb.mxu3 %v1030_v48  ;;  %v365_v48 = vand.u32 15, %v349_v46 }
 0x42a   : > { %v1117_v62 = vpop.permute.xlu1 %1116 }
 0x42e   : > { %2015 = vmatmul.msk.f32.vlgmr.msra.gmra.mxu3 %vm3308_vm1, %v854_v22  ;;  %v372_v22 = vand.u32 15, %v356_v15 }
 0x42f   : > { %2050 = vmatpush.msk.msra.mxu3 %vm2766_vm8, %v2433_v35 }
 0x430   : > { %v388_v28 = vsub.s32 %v356_v15, %v372_v22 }
 0x432   : > { %vm2771_vm9 = vcmp.eq.s32.totalorder %v388_v28, %v2763_v21 }
 0x433   : > { %2035 = vmatpush.msk.msra.mxu1 %vm2771_vm9, %v2433_v35  ;;  %2051 = vmatpush.msk.msra.mxu3 %vm2771_vm9, %v2433_v35 }
 0x435   : > { %2036 = vmatpush.msk.msra.mxu1 %vm2782_vm10, %v2433_v35  ;;  %2052 = vmatpush.msk.msra.mxu3 %vm2782_vm10, %v2433_v35 }
 0x44f   : > { %v1013_v49 = vpop.xlane.xlu0 %1012 }
 0x450   : > { %2287 = vrcp.f32 %v1013_v49  ;;  %v1025_v53 = vand.u32 2147483648, %v1013_v49  ;;  %v1023_v55 = vand.u32 2147483647, %v1013_v49  ;;  %vm1019_vm0 = vweird.f32 %v1013_v49 }
 0x452   : > { %v1026_v57 = vor.u32 1.1754944e-38, %v1025_v53  ;;  %vm1024_vm3 = vcmp.eq.f32.partialorder %v1023_v55, 8.507059e+37 }
 0x456   : > { %v2288_v50 = vpop.eup %2287 }
 0x457   : > { %v1015_v51 = vmul.f32 %v2288_v50, %v1013_v49  ;;  %vm1020_vm15 = vweird.f32 %v2288_v50  ;;  %v348_v49 = vadd.s32 48, %v2752_v12 }
 0x458   : > { %vm1021_vm2 = vmor %vm1019_vm0, %vm1020_vm15  ;;  %vm2848_vm15 = vcmp.eq.s32.totalorder %v382_v47, %v2763_v21 }
 0x459   : > { %v1016_v52 = vsub.f32 1.0, %v1015_v51  ;;  %v364_v53 = vand.u32 15, %v348_v49 }
 0x45b   : > { %v1017_v54 = vmul.f32 %v2288_v50, %v1016_v52  ;;  %v381_v52 = vsub.s32 %v349_v46, %v365_v48 }
 0x45d   : > { %v1018_v56 = vadd.f32 %v2288_v50, %v1017_v54  ;;  %vm2859_vm0 = vcmp.eq.s32.totalorder %v381_v52, %v2763_v21 }
 0x45f   : > { %v1022_v58 = vsel %vm1021_vm2, %v2288_v50, %v1018_v56  ;;  %v347_v50 = vadd.s32 40, %v2752_v12  ;;  %v380_v56 = vsub.s32 %v348_v49, %v364_v53  ;;  %vm972_vm2 = vcmask 786048  }
 0x460   : > { %v1027_v59 = vsel %vm1024_vm3, %v1026_v57, %v1022_v58  ;;  %v346_v57 = vadd.s32 32, %v2752_v12 }
 0x461   : > { %v1028_v60 = vmul.f32 %v2284_v34, %v1027_v59  ;;  %v368_v34 = vand.u32 15, %v352_v19  ;;  %v363_v54 = vand.u32 15, %v347_v50  ;;  %vm2871_vm3 = vcmp.eq.s32.totalorder %v380_v56, %v2763_v21 }
 0x462   : > { %v943_v61 = vpop.permute.xlu0 %942 }
 0x463   : > { %963 = vmatpush.msra.mxu2 %v943_v61  ;;  %2025 = vmatmul.msk.f32.vlgmr.msrb.gmra.mxu3 %vm3308_vm1, %v1028_v60  ;;  %2027 = vst.msk [vmem:[%s2662_s16 + $0x60] sm:$0xff] %vm3308_vm1, %v1028_v60  ;;  %v384_v38 = vsub.s32 %v352_v19, %v368_v34  ;;  %v379_v58 = vsub.s32 %v347_v50, %v363_v54  ;;  %v362_v60 = vand.u32 15, %v346_v57  ;;  %v345_v61 = vadd.s32 24, %v2752_v12 }
 0x464   : > { %2020 = vmatmul.msk.f32.vlgmr.msra.gmra.mxu2 %vm3308_vm1, %v2682_v23 }
 0x465   : > { %1137 = vmatpush.msrb.mxu2 %v1117_v62  ;;  %vm2816_vm13 = vcmp.eq.s32.totalorder %v384_v38, %v2763_v21  ;;  %v3364_v62 = vmov 0  ;;  %v1239_v38 = vld [vmem:[%s2571_s27] sm:$0xf] }
 0x466   : > { %v1242_v40 = vunpack.c.l.b16 %v1239_v38 }
 0x468   : > { %v1243_v42 = vpack.c.b16 %v1242_v40, %v1242_v40 }
 0x46a   : > { %v622_v63 = vpop.permute.xlu0 %621 }
 0x46b   : > { %625 = vst.msk [vmem:[#allocation2] sm:$0xff] %vm624_vm4, %v622_v63  ;;  %vm2880_vm4 = vcmp.eq.s32.totalorder %v379_v58, %v2763_v21 }
 0x46c   : > { %v791_v0 = vpop.f32.mrf.mxu2  ;;  %2030 = vmatmul.msk.f32.vlgmr.msrb.gmra.mxu2 %vm3308_vm1, %v1115_v33  ;;  %v386_v33 = vsub.s32 %v354_v17, %v370_v25  ;;  %v3365_v62 = vsel %vm2880_vm4, 4294967295, %v3364_v62  ;;  %v3374_v17 = vmov 0 }
 0x46d   : > { %795 = vrot.lane.b32.xlu1 %v791_v0, %s2431_s14  ;;  %v378_v0 = vsub.s32 %v346_v57, %v362_v60  ;;  %v1153_v60 = vld [vmem:[%s2581_s24] sm:$0xff] }
 0x46e   : > { %vm2793_vm11 = vcmp.eq.s32.totalorder %v386_v33, %v2763_v21 }
 0x46f   : > { %2037 = vmatpush.msk.msra.mxu1 %vm2793_vm11, %v2433_v35  ;;  %2053 = vmatpush.msk.msra.mxu3 %vm2793_vm11, %v2433_v35 }
 0x471   : > { %2038 = vmatpush.msk.msra.mxu1 %vm2804_vm12, %v2433_v35  ;;  %2054 = vmatpush.msk.msra.mxu3 %vm2804_vm12, %v2433_v35 }
 0x473   : > { %2039 = vmatpush.msk.msra.mxu1 %vm2816_vm13, %v2433_v35  ;;  %2055 = vmatpush.msk.msra.mxu3 %vm2816_vm13, %v2433_v35 }
 0x475   : > { %2040 = vmatpush.msk.msra.mxu1 %vm2835_vm14, %v2433_v35  ;;  %2056 = vmatpush.msk.msra.mxu3 %vm2835_vm14, %v2433_v35 }
 0x477   : > { %2041 = vmatpush.msk.msra.mxu1 %vm2848_vm15, %v2433_v35  ;;  %2057 = vmatpush.msk.msra.mxu3 %vm2848_vm15, %v2433_v35 }
 0x479   : > { %2042 = vmatpush.msk.msra.mxu1 %vm2859_vm0, %v2433_v35  ;;  %2058 = vmatpush.msk.msra.mxu3 %vm2859_vm0, %v2433_v35 }
 0x47b   : > { %2043 = vmatpush.msk.msra.mxu1 %vm2871_vm3, %v2433_v35  ;;  %2059 = vmatpush.msk.msra.mxu3 %vm2871_vm3, %v2433_v35 }
 0x47d   : > { %2044 = vmatpush.msk.msra.mxu1 %vm2880_vm4, %v2433_v35  ;;  %2060 = vmatpush.msk.msra.mxu3 %vm2880_vm4, %v2433_v35 }
 0x4a9   : > { %v704_v1 = vpop.f32.mrf.mxu3 }
 0x4aa   : > { %708 = vrot.lane.b32.xlu2 %v704_v1, %s2432_s15  ;;  %v361_v1 = vand.u32 15, %v345_v61 }
 0x4b1   : > { %v878_v2 = vpop.f32.mrf.mxu3 }
 0x4b2   : > { %882 = vrot.lane.b32.xlu0 %v878_v2, %s2428_s23  ;;  %v344_v2 = vadd.s32 16, %v2752_v12 }
 0x4df   : > { %v796_v7 = vpop.permute.xlu1 %795 }
 0x4e6   : > { %v1052_v3 = vpop.f32.mrf.mxu3 }
 0x4e7   : > { %v965_v4 = vpop.f32.mrf.mxu2  ;;  %1056 = vrot.lane.b32.xlu1 %v1052_v3, %s2427_s20  ;;  %v343_v3 = vadd.s32 8, %v2752_v12 }
 0x4e8   : > { %969 = vrot.lane.b32.xlu2 %v965_v4, %s2429_s29  ;;  %v358_v4 = vand.u32 15, %v2752_v12 }
 0x4e9   : > { %v359_v8 = vand.u32 15, %v343_v3 }
 0x4ea   : > { %v374_v14 = vsub.s32 %v2752_v12, %v358_v4  ;;  %v3372_v12 = vmov 0 }
 0x4eb   : > { %v375_v15 = vsub.s32 %v343_v3, %v359_v8 }
 0x4ec   : > { %vm2936_vm1 = vcmp.eq.s32.totalorder %v374_v14, %v2763_v21 }
 0x4ed   : > { %v3375_v17 = vsel %vm2936_vm1, 4294967295, %v3374_v17 }
 0x4ef   : > { %v1139_v23 = vpop.f32.mrf.mxu2  ;;  %1244 = vrot.lane.b32.xlu1 %v1243_v42, %s2434_s21 }
 0x4f0   : > { %1143 = vrot.lane.b32.xlu0 %v1139_v23, %s2426_s19  ;;  %v3366_v23 = vmov 0 }
 0x504   : > { %v709_v6 = vpop.permute.xlu2 %708 }
 0x505   : > { %712 = vst.msk [vmem:[#allocation2] sm:$0xff] %vm711_vm5, %v709_v6  ;;  %vm2897_vm5 = vcmp.eq.s32.totalorder %v378_v0, %v2763_v21  ;;  %v377_v6 = vsub.s32 %v345_v61, %v361_v1  ;;  %v2033_v0 = vld [vmem:[%s2581_s24 + $0x8] sm:$0xff] }
 0x506   : > { %799 = vst.msk [vmem:[#allocation2] sm:$0xff] %vm798_vm6, %v796_v7  ;;  %v3367_v23 = vsel %vm2897_vm5, 4294967295, %v3366_v23  ;;  %v360_v7 = vand.u32 15, %v344_v2  ;;  %2045 = vmatpush.msk.msra.mxu1 %vm2897_vm5, %v2433_v35  ;;  %2061 = vmatpush.msk.msra.mxu3 %vm2897_vm5, %v2433_v35 }
 0x507   : > { %vm2908_vm6 = vcmp.eq.s32.totalorder %v377_v6, %v2763_v21 }
 0x508   : > { %v376_v10 = vsub.s32 %v344_v2, %v360_v7  ;;  %2046 = vmatpush.msk.msra.mxu1 %vm2908_vm6, %v2433_v35  ;;  %2062 = vmatpush.msk.msra.mxu3 %vm2908_vm6, %v2433_v35  ;;  %v2958_v2 = vld [vmem:[%s2571_s27] sm:$0xff]  }
 0x509   : > { %v1299_v6 = vunpack.c.l.b16 %v2958_v2 }
 0x50b   : > { %v1300_v8 = vpack.c.b16 %v1299_v6, %v1299_v6 }
 0x524   : > { %v883_v9 = vpop.permute.xlu0 %882 }
 0x525   : > { %886 = vst.msk [vmem:[#allocation2] sm:$0xff] %vm885_vm7, %v883_v9  ;;  %v3368_v9 = vmov 0  ;;  %vm2920_vm7 = vcmp.eq.s32.totalorder %v376_v10, %v2763_v21 }
 0x526   : > { %v3369_v9 = vsel %vm2908_vm6, 4294967295, %v3368_v9  ;;  %v3371_v16 = vsel %vm2920_vm7, 4294967295, %v3370_v16  ;;  %2047 = vmatpush.msk.msra.mxu1 %vm2920_vm7, %v2433_v35  ;;  %2063 = vmatpush.msk.msra.mxu3 %vm2920_vm7, %v2433_v35  ;;  %vm1059_vm7 = vcmask 917248   ;;  %vm1146_vm6 = vcmask 1048448  }
 0x542   : > { %v970_v63 = vpop.permute.xlu2 %969 }
 0x543   : > { %973 = vst.msk [vmem:[#allocation2] sm:$0xff] %vm972_vm2, %v970_v63  ;;  %vm2928_vm2 = vcmp.eq.s32.totalorder %v375_v15, %v2763_v21  ;;  %v2974_v15 = vadd.s32 4294967295, %v2754_v13 }
 0x544   : > { %v3373_v12 = vsel %vm2928_vm2, 4294967295, %v3372_v12  ;;  %2048 = vmatpush.msk.msra.mxu1 %vm2928_vm2, %v2433_v35  ;;  %2064 = vmatpush.msk.msra.mxu3 %vm2928_vm2, %v2433_v35  ;;  %vm3321_vm2 = vcmask 1043456  }
 0x546   : > { %2049 = vmatpush.msk.msra.mxu1 %vm2936_vm1, %v2433_v35  ;;  %2065 = vmatpush.msk.msra.mxu3 %vm2936_vm1, %v2433_v35 }
 0x559   : > { %v1057_v18 = vpop.permute.xlu1 %1056 }
 0x55a   : > { %1060 = vst.msk [vmem:[#allocation2] sm:$0xff] %vm1059_vm7, %v1057_v18 }
 0x561   : > { %v1245_v10 = vpop.permute.xlu1 %1244 }
 0x562   : > { %v1144_v19 = vpop.permute.xlu0 %1143 }
 0x563   : > { %1147 = vst.msk [vmem:[#allocation2] sm:$0xff] %vm1146_vm6, %v1144_v19  ;;  %v2069_v19 = vld [vmem:[%s2576_s0 + $0x18] sm:$0xff] }
 0x564   : > { %1327 = vperm.xlu1 %2255, %v2069_v19  }
 0x56a   : > { %v1151_v20 = vld [vmem:[#allocation2] sm:$0xff] }
 0x56b   : > { %v1152_v21 = vadd.f32 %v1151_v20, %v2597_v5 }
 0x56d   : > { %1172 = vmatmul.f32.vlgmr.msra.gmra.mxu1 %v1152_v21 }
 0x5ea   : > { %v1173_v22 = vpop.f32.mrf.mxu1 }
 0x5eb   : > { %v1176_v24 = vrot.slane %v1173_v22, 4 }
 0x5ed   : > { %v1177_v25 = vadd.f32 %v1176_v24, %v1173_v22 }
 0x5ef   : > { %v1178_v27 = vrot.slane %v1177_v25, 2 }
 0x5f1   : > { %v1179_v28 = vadd.f32 %v1178_v27, %v1177_v25  ;;  %v3002_v25 = vadd.s32 1, %v2754_v13 }
 0x5f3   : > { %v1180_v29 = vrot.slane %v1179_v28, 1 }
 0x5f5   : > { %v1181_v30 = vadd.f32 %v1180_v29, %v1179_v28 }
 0x5f7   : > { %v1182_v33 = vmul.f32 0.0078125, %v1181_v30 }
 0x5f9   : > { %v1183_v34 = vsub.f32 %v1152_v21, %v1182_v33 }
 0x5fb   : > { %v1184_v36 = vmul.f32 %v1183_v34, %v1183_v34 }
 0x5fd   : > { %1201 = vmatmul.f32.vlgmr.msra.gmra.mxu3 %v1184_v36 }
 0x680   : > { %v1202_v43 = vpop.f32.mrf.mxu3 }
 0x681   : > { %v1205_v44 = vrot.slane %v1202_v43, 4 }
 0x683   : > { %v1206_v5 = vadd.f32 %v1205_v44, %v1202_v43  ;;  %v1328_v43 = vpop.permute.xlu1 %1327 }
 0x685   : > { %v1207_v45 = vrot.slane %v1206_v5, 2 }
 0x687   : > { %v1208_v46 = vadd.f32 %v1207_v45, %v1206_v5 }
 0x689   : > { %v1209_v47 = vrot.slane %v1208_v46, 1 }
 0x68b   : > { %v1210_v48 = vadd.f32 %v1209_v47, %v1208_v46 }
 0x68d   : > { %v1211_v49 = vmul.f32 0.0078125, %v1210_v48 }
 0x68f   : > { %v1212_v50 = vadd.f32 1e-05, %v1211_v49 }
 0x691   : > { %2289 = vrsqrt.f32 %v1212_v50  ;;  %vm1219_vm7 = vweird.f32 %v1212_v50 }
 0x697   : > { %v2290_v52 = vpop.eup %2289 }
 0x698   : > { %v1214_v53 = vmul.f32 %v2290_v52, %v1212_v50  ;;  %vm1220_vm6 = vweird.f32 %v2290_v52 }
 0x699   : > { %vm1221_vm1 = vmor %vm1219_vm7, %vm1220_vm6  ;;  %vm3320_vm6 = vcmask 1047560   ;;  %vm3317_vm7 = vcmp.ge.s32.totalorder %v2974_v15, 0 }
 0x69a   : > { %v1215_v54 = vmul.f32 %v2290_v52, %v1214_v53 }
 0x69c   : > { %v1216_v56 = vmul.f32 0.5, %v1215_v54 }
 0x69e   : > { %v1217_v57 = vsub.f32 1.5, %v1216_v56 }
 0x6a0   : > { %v1218_v58 = vmul.f32 %v2290_v52, %v1217_v57 }
 0x6a2   : > { %v1222_v61 = vsel %vm1221_vm1, %v2290_v52, %v1218_v58  ;;  %vm3376_vm1 = vcmask 64512  }
 0x6a3   : > { %v1223_v63 = vmul.f32 %v1222_v61, %v1183_v34 }
 0x6a5   : > { %v1224_v1 = vmul.f32 %v1223_v63, %v1153_v60 }
 0x6a7   : > { %v2960_v3 = vadd.f32 %v2033_v0, %v1224_v1 }
 0x6a9   : > { %1285 = vrot.lane.b32.xlu0 %v2960_v3, %s2435_s10  ;;  %1227 = vrot.lane.b32.xlu2 %v2960_v3, %s2436_s17  ;;  %v1240_v4 = vpack.c.bf16 %v2960_v3, %v2960_v3 }
 0x6ab   : > { %v1251_v7 = vsel %vm3321_vm2, %v1240_v4, 0 }
 0x6ac   : > { %1260 = vmatpush.bf16.msra.mxu0 %v1251_v7 }
 0x6af   : > { %2066 = vmatmul.msk.bf16.vlgmr.msra.gmra.mxu0 %vm3376_vm1, %v1245_v10 }
 0x6b1   : > { %1301 = vrot.lane.b32.xlu2 %v1300_v8, %s2426_s19  ;;  %v1469_v8 = vunpack.c.h.b16 %v2958_v2 }
 0x6b3   : > { %v1470_v10 = vpack.c.b16 %v1469_v8, %v1469_v8  ;;  %v2144_v8 = vld [vmem:[%s2571_s27 + $0x8] sm:$0xf] }
 0x6b5   : > { %1471 = vrot.lane.b32.xlu1 %v1470_v10, %s2426_s19  ;;  %v1588_v10 = vunpack.c.l.b16 %v2144_v8 }
 0x703   : > { %v1228_v14 = vpop.permute.xlu2 %1227 }
 0x704   : > { %1231 = vst.msk [vmem:[#allocation2] sm:$0xff] %vm3320_vm6, %v1228_v14  ;;  %vm3379_vm6 = vnez %v3371_v16 }
 0x70b   : > { %v1236_v18 = vld [vmem:[#allocation2] sm:$0xff]  ;;  %v1302_v30 = vpop.permute.xlu2 %1301 }
 0x70c   : > { %v1237_v20 = vsel %vm3317_vm7, %v1236_v18, 0.0  ;;  %vm3319_vm7 = vcmask 1039360  }
 0x70d   : > { %v1238_v21 = vpack.c.bf16 %v1237_v20, %v1237_v20 }
 0x70f   : > { %v1270_v22 = vsel %vm3321_vm2, %v1238_v21, 0 }
 0x710   : > { %1279 = vmatpush.bf16.msra.mxu2 %v1270_v22 }
 0x713   : > { %2067 = vmatmul.msk.bf16.vlgmr.msra.gmra.mxu2 %vm3376_vm1, %v1239_v38  ;;  %vm3318_vm1 = vcmp.lt.s32.totalorder %v3002_v25, 16 }
 0x714   : > { %2072 = vmatpush.msk.msrb.mxu2 %vm2766_vm8, %v2433_v35 }
 0x716   : > { %2073 = vmatpush.msk.msrb.mxu2 %vm2771_vm9, %v2433_v35 }
 0x718   : > { %2074 = vmatpush.msk.msrb.mxu2 %vm2782_vm10, %v2433_v35 }
 0x71a   : > { %2075 = vmatpush.msk.msrb.mxu2 %vm2793_vm11, %v2433_v35 }
 0x71b   : > { %v1286_v24 = vpop.permute.xlu0 %1285 }
 0x71c   : > { %2076 = vmatpush.msk.msrb.mxu2 %vm2804_vm12, %v2433_v35  ;;  %1289 = vst.msk [vmem:[#allocation2] sm:$0xff] %vm3319_vm7, %v1286_v24  ;;  %vm3378_vm7 = vcmask 64512   ;;  %v2070_v24 = vld [vmem:[%s2581_s24 + $0x10] sm:$0xff] }
 0x71e   : > { %2077 = vmatpush.msk.msrb.mxu2 %vm2816_vm13, %v2433_v35 }
 0x720   : > { %2078 = vmatpush.msk.msrb.mxu2 %vm2835_vm14, %v2433_v35 }
 0x722   : > { %2079 = vmatpush.msk.msrb.mxu2 %vm2848_vm15, %v2433_v35 }
 0x723   : > { %v1294_v27 = vld [vmem:[#allocation2] sm:$0xff] }
 0x724   : > { %2080 = vmatpush.msk.msrb.mxu2 %vm2859_vm0, %v2433_v35  ;;  %v1295_v28 = vsel %vm3318_vm1, %v1294_v27, 0.0  ;;  %vm3377_vm1 = vnez %v3369_v9 }
 0x725   : > { %v1296_v13 = vpack.c.bf16 %v1295_v28, %v1295_v28 }
 0x726   : > { %2081 = vmatpush.msk.msrb.mxu2 %vm2871_vm3, %v2433_v35 }
 0x727   : > { %v1307_v29 = vsel %vm3321_vm2, %v1296_v13, 0  ;;  %vm3380_vm2 = vnez %v3373_v12  ;;  %v2071_v13 = vld [vmem:[%s2581_s24 + $0x18] sm:$0xff] }
 0x728   : > { %2082 = vmatpush.msk.msrb.mxu2 %vm2880_vm4, %v2433_v35  ;;  %1316 = vmatpush.bf16.msrb.mxu0 %v1307_v29 }
 0x72a   : > { %2083 = vmatpush.msk.msrb.mxu2 %vm2897_vm5, %v2433_v35 }
 0x72b   : > { %2068 = vmatmul.msk.bf16.vlgmr.msrb.gmra.mxu0 %vm3378_vm7, %v1302_v30  ;;  %v2104_v30 = vld [vmem:[%s2571_s27 + $0x4] sm:$0xf] }
 0x72c   : > { %2088 = vmatpush.msk.msra.mxu0 %vm2766_vm8, %v2433_v35  ;;  %2084 = vmatpush.msk.msrb.mxu2 %vm3377_vm1, %v2433_v35  ;;  %vm3381_vm8 = vnez %v3375_v17  ;;  %v1262_v33 = vpop.f32.mrf.mxu0 }
 0x72e   : > { %2085 = vmatpush.msk.msrb.mxu2 %vm3379_vm6, %v2433_v35  ;;  %2089 = vmatpush.msk.msra.mxu0 %vm2771_vm9, %v2433_v35 }
 0x730   : > { %2086 = vmatpush.msk.msrb.mxu2 %vm3380_vm2, %v2433_v35  ;;  %2090 = vmatpush.msk.msra.mxu0 %vm2782_vm10, %v2433_v35 }
 0x732   : > { %2087 = vmatpush.msk.msrb.mxu2 %vm3381_vm8, %v2433_v35  ;;  %2091 = vmatpush.msk.msra.mxu0 %vm2793_vm11, %v2433_v35 }
 0x734   : > { %2092 = vmatpush.msk.msra.mxu0 %vm2804_vm12, %v2433_v35  ;;  %v1264_v34 = vpop.f32.mrf.mxu0 }
 0x735   : > { %v1418_v34 = vunpack.c.l.b16 %v2104_v30 }
 0x736   : > { %2093 = vmatpush.msk.msra.mxu0 %vm2816_vm13, %v2433_v35 }
 0x738   : > { %2094 = vmatpush.msk.msra.mxu0 %vm2835_vm14, %v2433_v35 }
 0x73a   : > { %2095 = vmatpush.msk.msra.mxu0 %vm2848_vm15, %v2433_v35 }
 0x73c   : > { %2096 = vmatpush.msk.msra.mxu0 %vm2859_vm0, %v2433_v35 }
 0x73e   : > { %2097 = vmatpush.msk.msra.mxu0 %vm2871_vm3, %v2433_v35 }
 0x740   : > { %2098 = vmatpush.msk.msra.mxu0 %vm2880_vm4, %v2433_v35 }
 0x742   : > { %2099 = vmatpush.msk.msra.mxu0 %vm2897_vm5, %v2433_v35 }
 0x744   : > { %2100 = vmatpush.msk.msra.mxu0 %vm3377_vm1, %v2433_v35 }
 0x746   : > { %2101 = vmatpush.msk.msra.mxu0 %vm3379_vm6, %v2433_v35  ;;  %vm3382_vm6 = vcmask 1043456  }
 0x748   : > { %2102 = vmatpush.msk.msra.mxu0 %vm3380_vm2, %v2433_v35 }
 0x74a   : > { %2103 = vmatpush.msk.msra.mxu0 %vm3381_vm8, %v2433_v35 }
 0x796   : > { %v1281_v36 = vpop.f32.mrf.mxu2 }
 0x797   : > { %v1282_v40 = vadd.f32 %v1281_v36, %v1262_v33 }
 0x79e   : > { %v1283_v38 = vpop.f32.mrf.mxu2 }
 0x79f   : > { %v1419_v38 = vpack.c.b16 %v1418_v34, %v1418_v34 }
 0x7a8   : > { %v1318_v42 = vpop.f32.mrf.mxu0 }
 0x7a9   : > { %v1322_v44 = vadd.f32 %v1318_v42, %v1282_v40  ;;  %v2109_v40 = vld [vmem:[%s2576_s0 + $0x20] sm:$0xff] }
 0x7ab   : > { %v1330_v5 = vadd.f32 %v1328_v43, %v1322_v44 }
 0x7ad   : > { %v1331_v45 = vadd.f32 %v1330_v5, %v2960_v3 }
 0x7af   : > { %1352 = vmatmul.f32.vlgmr.msrb.gmra.mxu2 %v1331_v45 }
 0x7b0   : > { %v1320_v46 = vpop.f32.mrf.mxu0 }
 0x832   : > { %v1353_v47 = vpop.f32.mrf.mxu2 }
 0x833   : > { %v1356_v48 = vrot.slane %v1353_v47, 4 }
 0x835   : > { %v1357_v49 = vadd.f32 %v1356_v48, %v1353_v47 }
 0x837   : > { %v1358_v50 = vrot.slane %v1357_v49, 2 }
 0x839   : > { %v1359_v52 = vadd.f32 %v1358_v50, %v1357_v49 }
 0x83b   : > { %v1360_v53 = vrot.slane %v1359_v52, 1 }
 0x83d   : > { %v1361_v54 = vadd.f32 %v1360_v53, %v1359_v52 }
 0x83f   : > { %v1362_v56 = vmul.f32 0.0078125, %v1361_v54 }
 0x841   : > { %v1363_v57 = vsub.f32 %v1331_v45, %v1362_v56 }
 0x843   : > { %v1364_v58 = vmul.f32 %v1363_v57, %v1363_v57 }
 0x845   : > { %1381 = vmatmul.f32.vlgmr.msra.gmra.mxu0 %v1364_v58 }
 0x8c2   : > { %v1382_v60 = vpop.f32.mrf.mxu0 }
 0x8c3   : > { %v1385_v61 = vrot.slane %v1382_v60, 4 }
 0x8c5   : > { %v1386_v63 = vadd.f32 %v1385_v61, %v1382_v60 }
 0x8c7   : > { %v1387_v0 = vrot.slane %v1386_v63, 2 }
 0x8c9   : > { %v1388_v1 = vadd.f32 %v1387_v0, %v1386_v63 }
 0x8cb   : > { %v1389_v4 = vrot.slane %v1388_v1, 1 }
 0x8cd   : > { %v1390_v3 = vadd.f32 %v1389_v4, %v1388_v1 }
 0x8cf   : > { %v1391_v6 = vmul.f32 0.0078125, %v1390_v3 }
 0x8d1   : > { %v1392_v7 = vadd.f32 1e-05, %v1391_v6 }
 0x8d3   : > { %2291 = vrsqrt.f32 %v1392_v7  ;;  %vm1399_vm8 = vweird.f32 %v1392_v7 }
 0x8d9   : > { %v2292_v14 = vpop.eup %2291 }
 0x8da   : > { %v1394_v18 = vmul.f32 %v2292_v14, %v1392_v7  ;;  %vm1400_vm7 = vweird.f32 %v2292_v14 }
 0x8db   : > { %vm1401_vm2 = vmor %vm1399_vm8, %vm1400_vm7  ;;  %vm3383_vm8 = vnez %v3345_v31  ;;  %vm3386_vm7 = vnez %v3375_v17  ;;  %v1472_v31 = vpop.permute.xlu1 %1471 }
 0x8dc   : > { %v1395_v19 = vmul.f32 %v2292_v14, %v1394_v18 }
 0x8de   : > { %v1396_v20 = vmul.f32 0.5, %v1395_v19 }
 0x8e0   : > { %v1397_v21 = vsub.f32 1.5, %v1396_v20 }
 0x8e2   : > { %v1398_v22 = vmul.f32 %v2292_v14, %v1397_v21 }
 0x8e4   : > { %v1402_v27 = vsel %vm1401_vm2, %v2292_v14, %v1398_v22  ;;  %vm3384_vm2 = vnez %v3371_v16  ;;  %v1589_v14 = vpack.c.b16 %v1588_v10, %v1588_v10 }
 0x8e5   : > { %v1403_v28 = vmul.f32 %v1402_v27, %v1363_v57  ;;  %v2110_v27 = vld [vmem:[%s2581_s24 + $0x20] sm:$0xff] }
 0x8e7   : > { %v1404_v29 = vmul.f32 %v2070_v24, %v1403_v28 }
 0x8e9   : > { %v3093_v2 = vadd.f32 %v2071_v13, %v1404_v29  ;;  %v2111_v29 = vld [vmem:[%s2581_s24 + $0x28] sm:$0xff] }
 0x8eb   : > { %1460 = vrot.lane.b32.xlu2 %v3093_v2, %s2435_s10  ;;  %1407 = vrot.lane.b32.xlu0 %v3093_v2, %s2436_s17  ;;  %v1416_v33 = vpack.c.bf16 %v3093_v2, %v3093_v2 }
 0x8ed   : > { %v1426_v36 = vsel %vm3382_vm6, %v1416_v33, 0  ;;  %vm3385_vm6 = vnez %v3373_v12 }
 0x8ee   : > { %1435 = vmatpush.bf16.msrb.mxu1 %v1426_v36 }
 0x8f2   : > { %2112 = vmatpush.msk.msra.mxu1 %vm3383_vm8, %v2433_v35 }
 0x8f3   : > { %1420 = vrot.lane.b32.xlu0 %v1419_v38, %s2434_s21  ;;  %1497 = vperm.xlu2 %2256, %v2109_v40  }
 0x8f4   : > { %2113 = vmatpush.msk.msra.mxu1 %vm2771_vm9, %v2433_v35 }
 0x8f6   : > { %2114 = vmatpush.msk.msra.mxu1 %vm2782_vm10, %v2433_v35 }
 0x8f8   : > { %2115 = vmatpush.msk.msra.mxu1 %vm2793_vm11, %v2433_v35 }
 0x8fa   : > { %2116 = vmatpush.msk.msra.mxu1 %vm2804_vm12, %v2433_v35 }
 0x8fb   : > { %1590 = vrot.lane.b32.xlu2 %v1589_v14, %s2434_s21 }
 0x8fc   : > { %2117 = vmatpush.msk.msra.mxu1 %vm2816_vm13, %v2433_v35 }
 0x8fe   : > { %2118 = vmatpush.msk.msra.mxu1 %vm2835_vm14, %v2433_v35 }
 0x900   : > { %2119 = vmatpush.msk.msra.mxu1 %vm2848_vm15, %v2433_v35 }
 0x902   : > { %2120 = vmatpush.msk.msra.mxu1 %vm2859_vm0, %v2433_v35 }
 0x904   : > { %2121 = vmatpush.msk.msra.mxu1 %vm2871_vm3, %v2433_v35 }
 0x906   : > { %2122 = vmatpush.msk.msra.mxu1 %vm2880_vm4, %v2433_v35  ;;  %vm3390_vm4 = vcmask 64512  }
 0x908   : > { %2123 = vmatpush.msk.msra.mxu1 %vm2897_vm5, %v2433_v35  ;;  %vm3387_vm5 = vcmask 1047560  }
 0x90a   : > { %2124 = vmatpush.msk.msra.mxu1 %vm3377_vm1, %v2433_v35  ;;  %vm3388_vm1 = vcmp.ge.s32.totalorder %v2974_v15, 0 }
 0x90c   : > { %2125 = vmatpush.msk.msra.mxu1 %vm3384_vm2, %v2433_v35  ;;  %vm3389_vm2 = vcmask 1039360  }
 0x90e   : > { %2126 = vmatpush.msk.msra.mxu1 %vm3385_vm6, %v2433_v35  ;;  %vm3391_vm6 = vcmask 1043456  }
 0x910   : > { %2127 = vmatpush.msk.msra.mxu1 %vm3386_vm7, %v2433_v35  ;;  %vm3392_vm7 = vmmov %vm3390_vm4 }
 0x945   : > { %v1461_v43 = vpop.permute.xlu2 %1460 }
 0x94d   : > { %v1498_v41 = vpop.permute.xlu2 %1497 }
 0x95d   : > { %v1408_v42 = vpop.permute.xlu0 %1407 }
 0x95e   : > { %1410 = vst.msk [vmem:[#allocation2] sm:$0xff] %vm3387_vm5, %v1408_v42  ;;  %vm3393_vm5 = vcmp.lt.s32.totalorder %v3002_v25, 16  ;;  %v2149_v42 = vld [vmem:[%s2576_s0 + $0x28] sm:$0xff] }
 0x965   : > { %v1411_v44 = vld [vmem:[#allocation2] sm:$0xff]  ;;  %v1421_v5 = vpop.permute.xlu0 %1420 }
 0x966   : > { %v1412_v45 = vsel %vm3388_vm1, %v1411_v44, 0.0  ;;  %1463 = vst.msk [vmem:[#allocation2] sm:$0xff] %vm3389_vm2, %v1461_v43  ;;  %2105 = vmatmul.msk.bf16.vlgmr.msrb.gmra.mxu1 %vm3390_vm4, %v1421_v5  ;;  %vm3394_vm4 = vmmov %vm3391_vm6  ;;  %v1591_v43 = vpop.permute.xlu2 %1590 }
 0x967   : > { %v1413_v46 = vpack.c.bf16 %v1412_v45, %v1412_v45  ;;  %vm3395_vm1 = vmmov %vm3392_vm7 }
 0x968   : > { %vm3403_vm2 = vmmov %vm3395_vm1 }
 0x969   : > { %v1445_v47 = vsel %vm3391_vm6, %v1413_v46, 0  ;;  %vm3404_vm6 = vcmask 1047560  }
 0x96a   : > { %1454 = vmatpush.bf16.msrb.mxu3 %v1445_v47 }
 0x96d   : > { %2106 = vmatmul.msk.bf16.vlgmr.msrb.gmra.mxu3 %vm3392_vm7, %v2104_v30  ;;  %v1464_v48 = vld [vmem:[#allocation2] sm:$0xff]  ;;  %vm3405_vm7 = vcmp.ge.s32.totalorder %v2974_v15, 0 }
 0x96e   : > { %2128 = vmatpush.msk.msra.mxu3 %vm3383_vm8, %v2433_v35  ;;  %v1465_v49 = vsel %vm3393_vm5, %v1464_v48, 0.0  ;;  %vm3402_vm8 = vmmov %vm3394_vm4  ;;  %vm3406_vm5 = vcmask 1039360  }
 0x96f   : > { %v1466_v50 = vpack.c.bf16 %v1465_v49, %v1465_v49 }
 0x970   : > { %2129 = vmatpush.msk.msra.mxu3 %vm2771_vm9, %v2433_v35  ;;  %vm3396_vm9 = vnez %v3365_v62 }
 0x971   : > { %v1477_v52 = vsel %vm3394_vm4, %v1466_v50, 0 }
 0x972   : > { %2130 = vmatpush.msk.msra.mxu3 %vm2782_vm10, %v2433_v35  ;;  %1486 = vmatpush.bf16.msra.mxu2 %v1477_v52  ;;  %vm3397_vm10 = vnez %v3367_v23 }
 0x974   : > { %2131 = vmatpush.msk.msra.mxu3 %vm2793_vm11, %v2433_v35  ;;  %vm3398_vm11 = vnez %v3369_v9 }
 0x975   : > { %2108 = vmatmul.msk.bf16.vlgmr.msra.gmra.mxu2 %vm3395_vm1, %v1472_v31 }
 0x976   : > { %2132 = vmatpush.msk.msra.mxu3 %vm2804_vm12, %v2433_v35  ;;  %vm3399_vm12 = vnez %v3371_v16 }
 0x978   : > { %2133 = vmatpush.msk.msra.mxu3 %vm2816_vm13, %v2433_v35  ;;  %vm3400_vm13 = vnez %v3373_v12 }
 0x97a   : > { %2134 = vmatpush.msk.msra.mxu3 %vm2835_vm14, %v2433_v35  ;;  %vm3401_vm14 = vnez %v3375_v17 }
 0x97c   : > { %2135 = vmatpush.msk.msra.mxu3 %vm2848_vm15, %v2433_v35 }
 0x97e   : > { %2136 = vmatpush.msk.msra.mxu3 %vm2859_vm0, %v2433_v35 }
 0x980   : > { %2137 = vmatpush.msk.msra.mxu3 %vm2871_vm3, %v2433_v35 }
 0x982   : > { %2138 = vmatpush.msk.msra.mxu3 %vm3396_vm9, %v2433_v35  ;;  %vm3407_vm9 = vcmp.lt.s32.totalorder %v3002_v25, 16 }
 0x984   : > { %2139 = vmatpush.msk.msra.mxu3 %vm3397_vm10, %v2433_v35  ;;  %vm3408_vm10 = vmmov %vm3394_vm4 }
 0x986   : > { %2140 = vmatpush.msk.msra.mxu3 %vm3398_vm11, %v2433_v35  ;;  %vm3409_vm11 = vmmov %vm3395_vm1 }
 0x988   : > { %2141 = vmatpush.msk.msra.mxu3 %vm3399_vm12, %v2433_v35  ;;  %vm3410_vm12 = vmmov %vm3394_vm4 }
 0x98a   : > { %2142 = vmatpush.msk.msra.mxu3 %vm3400_vm13, %v2433_v35  ;;  %vm3411_vm13 = vmmov %vm3404_vm6 }
 0x98c   : > { %2143 = vmatpush.msk.msra.mxu3 %vm3401_vm14, %v2433_v35  ;;  %vm3412_vm14 = vmmov %vm3395_vm1 }
 0x9e3   : > { %v1437_v32 = vpop.f32.mrf.mxu1 }
 0x9eb   : > { %v1439_v26 = vpop.f32.mrf.mxu1 }
 0x9f0   : > { %v1456_v37 = vpop.f32.mrf.mxu3 }
 0x9f1   : > { %v1457_v39 = vadd.f32 %v1456_v37, %v1437_v32 }
 0x9f8   : > { %v1458_v11 = vpop.f32.mrf.mxu3  ;;  %v1488_v51 = vpop.f32.mrf.mxu2 }
 0x9f9   : > { %v1492_v55 = vadd.f32 %v1488_v51, %v1457_v39  ;;  %v2150_v39 = vld [vmem:[%s2571_s27 + $0xc] sm:$0xf] }
 0x9fb   : > { %v1500_v59 = vadd.f32 %v1498_v41, %v1492_v55  ;;  %v1683_v41 = vunpack.c.l.b16 %v2150_v39 }
 0x9fd   : > { %v1501_v62 = vadd.f32 %v1500_v59, %v3093_v2  ;;  %v2147_v2 = vld [vmem:[%s2571_s27 + $0x8] sm:$0xff]   ;;  %v1684_v11 = vpack.c.b16 %v1683_v41, %v1683_v41  ;;  %s1786_s27 = sshll.u32 %s2589_s11, 4  ;;  %s1787_s27 = int_to_ptr.vmem [resolvable:$true] %s1786_s27 }
 0x9fe   : > { %v1639_v36 = vunpack.c.l.b16 %v2147_v2 }
 0x9ff   : > { %1522 = vmatmul.f32.vlgmr.msra.gmra.mxu1 %v1501_v62 }
 0xa00   : > { %v1490_v23 = vpop.f32.mrf.mxu2  ;;  %v1640_v40 = vpack.c.b16 %v1639_v36, %v1639_v36 }
 0xa7c   : > { %v1523_v9 = vpop.f32.mrf.mxu1 }
 0xa7d   : > { %v1526_v16 = vrot.slane %v1523_v9, 4 }
 0xa7f   : > { %v1527_v12 = vadd.f32 %v1526_v16, %v1523_v9 }
 0xa81   : > { %v1528_v53 = vrot.slane %v1527_v12, 2 }
 0xa83   : > { %v1529_v54 = vadd.f32 %v1528_v53, %v1527_v12  ;;  %v1734_v12 = vunpack.c.h.b16 %v2147_v2 }
 0xa85   : > { %v1530_v17 = vrot.slane %v1529_v54, 1 }
 0xa87   : > { %v1531_v35 = vadd.f32 %v1530_v17, %v1529_v54 }
 0xa89   : > { %v1532_v56 = vmul.f32 0.0078125, %v1531_v35  ;;  %v1735_v35 = vpack.c.b16 %v1734_v12, %v1734_v12 }
 0xa8b   : > { %v1533_v57 = vsub.f32 %v1501_v62, %v1532_v56  ;;  %v2155_v56 = vld [vmem:[%s2576_s0 + $0x30] sm:$0xff] }
 0xa8d   : > { %v1534_v58 = vmul.f32 %v1533_v57, %v1533_v57 }
 0xa8f   : > { %1551 = vmatmul.f32.vlgmr.msra.gmra.mxu3 %v1534_v58 }
 0xb12   : > { %v1552_v60 = vpop.f32.mrf.mxu3 }
 0xb13   : > { %v1555_v61 = vrot.slane %v1552_v60, 4 }
 0xb15   : > { %v1556_v63 = vadd.f32 %v1555_v61, %v1552_v60 }
 0xb17   : > { %v1557_v0 = vrot.slane %v1556_v63, 2 }
 0xb19   : > { %v1558_v1 = vadd.f32 %v1557_v0, %v1556_v63 }
 0xb1b   : > { %v1559_v4 = vrot.slane %v1558_v1, 1 }
 0xb1d   : > { %v1560_v3 = vadd.f32 %v1559_v4, %v1558_v1 }
 0xb1f   : > { %v1561_v6 = vmul.f32 0.0078125, %v1560_v3 }
 0xb21   : > { %v1562_v7 = vadd.f32 1e-05, %v1561_v6 }
 0xb23   : > { %2293 = vrsqrt.f32 %v1562_v7  ;;  %vm1569_vm0 = vweird.f32 %v1562_v7 }
 0xb29   : > { %v2294_v18 = vpop.eup %2293 }
 0xb2a   : > { %v1564_v19 = vmul.f32 %v2294_v18, %v1562_v7  ;;  %vm1570_vm15 = vweird.f32 %v2294_v18 }
 0xb2b   : > { %vm1571_vm3 = vmor %vm1569_vm0, %vm1570_vm15 }
 0xb2c   : > { %v1565_v20 = vmul.f32 %v2294_v18, %v1564_v19  ;;  %vm3413_vm15 = vmmov %vm3405_vm7 }
 0xb2d   : > { %vm3414_vm0 = vmmov %vm3394_vm4 }
 0xb2e   : > { %v1566_v21 = vmul.f32 0.5, %v1565_v20 }
 0xb30   : > { %v1567_v22 = vsub.f32 1.5, %v1566_v21 }
 0xb32   : > { %v1568_v24 = vmul.f32 %v2294_v18, %v1567_v22 }
 0xb34   : > { %v1572_v28 = vsel %vm1571_vm3, %v2294_v18, %v1568_v24  ;;  %vm3415_vm3 = vmmov %vm3395_vm1 }
 0xb35   : > { %v1573_v13 = vmul.f32 %v1572_v28, %v1533_v57 }
 0xb37   : > { %v1574_v30 = vmul.f32 %v2110_v27, %v1573_v13 }
 0xb39   : > { %v1575_v33 = vadd.f32 %v2111_v29, %v1574_v30 }
 0xb3b   : > { %1630 = vrot.lane.b32.xlu0 %v1575_v33, %s2435_s10  ;;  %1577 = vrot.lane.b32.xlu1 %v1575_v33, %s2436_s17  ;;  %v1586_v34 = vpack.c.bf16 %v1575_v33, %v1575_v33 }
 0xb3d   : > { %v1596_v38 = vsel %vm3402_vm8, %v1586_v34, 0  ;;  %vm3416_vm8 = vmmov %vm3406_vm5 }
 0xb3e   : > { %1605 = vmatpush.bf16.msrb.mxu0 %v1596_v38 }
 0xb41   : > { %2145 = vmatmul.msk.bf16.vlgmr.msrb.gmra.mxu0 %vm3403_vm2, %v1591_v43  ;;  %vm3417_vm2 = vmmov %vm3407_vm9 }
 0xb43   : > { %1667 = vperm.xlu0 %2254, %v2149_v42   ;;  %1641 = vrot.lane.b32.xlu1 %v1640_v40, %s2426_s19 }
 0xb4b   : > { %1685 = vrot.lane.b32.xlu0 %v1684_v11, %s2434_s21 }
 0xbad   : > { %v1578_v44 = vpop.permute.xlu1 %1577  ;;  %v1631_v5 = vpop.permute.xlu0 %1630 }
 0xbae   : > { %1580 = vst.msk [vmem:[#allocation2] sm:$0xff] %vm3404_vm6, %v1578_v44  ;;  %vm3418_vm6 = vmmov %vm3414_vm0 }
 0xbb5   : > { %v1581_v45 = vld [vmem:[#allocation2] sm:$0xff]  ;;  %v1642_v32 = vpop.permute.xlu1 %1641  ;;  %v1668_v23 = vpop.permute.xlu0 %1667 }
 0xbb6   : > { %v1582_v46 = vsel %vm3405_vm7, %v1581_v45, 0.0  ;;  %1633 = vst.msk [vmem:[#allocation2] sm:$0xff] %vm3406_vm5, %v1631_v5  ;;  %vm3419_vm7 = vmmov %vm3395_vm1 }
 0xbb7   : > { %v1583_v47 = vpack.c.bf16 %v1582_v46, %v1582_v46 }
 0xbb9   : > { %v1615_v48 = vsel %vm3394_vm4, %v1583_v47, 0 }
 0xbba   : > { %1624 = vmatpush.bf16.msrb.mxu2 %v1615_v48 }
 0xbbd   : > { %2146 = vmatmul.msk.bf16.vlgmr.msrb.gmra.mxu2 %vm3395_vm1, %v2144_v8  ;;  %v1634_v49 = vld [vmem:[#allocation2] sm:$0xff]  ;;  %v1686_v58 = vpop.permute.xlu0 %1685 }
 0xbbe   : > { %v1635_v50 = vsel %vm3407_vm9, %v1634_v49, 0.0  ;;  %v1607_v26 = vpop.f32.mrf.mxu0 }
 0xbbf   : > { %v1636_v52 = vpack.c.bf16 %v1635_v50, %v1635_v50 }
 0xbc1   : > { %v1647_v31 = vsel %vm3408_vm10, %v1636_v52, 0 }
 0xbc2   : > { %1656 = vmatpush.bf16.msrb.mxu1 %v1647_v31 }
 0xbc5   : > { %2148 = vmatmul.msk.bf16.vlgmr.msrb.gmra.mxu1 %vm3409_vm11, %v1642_v32 }
 0xbc6   : > { %v1609_v37 = vpop.f32.mrf.mxu0 }
 0xc40   : > { %v1626_v51 = vpop.f32.mrf.mxu2 }
 0xc41   : > { %v1627_v55 = vadd.f32 %v1626_v51, %v1607_v26 }
 0xc42   : > { %v1658_v59 = vpop.f32.mrf.mxu1 }
 0xc43   : > { %v1662_v62 = vadd.f32 %v1658_v59, %v1627_v55 }
 0xc45   : > { %v1670_v9 = vadd.f32 %v1668_v23, %v1662_v62 }
 0xc47   : > { %1725 = vrot.lane.b32.xlu1 %v1670_v9, %s2435_s10  ;;  %1672 = vrot.lane.b32.xlu2 %v1670_v9, %s2436_s17  ;;  %v1681_v16 = vpack.c.bf16 %v1670_v9, %v1670_v9 }
 0xc48   : > { %v1628_v53 = vpop.f32.mrf.mxu2 }
 0xc49   : > { %v1691_v54 = vsel %vm3410_vm12, %v1681_v16, 0 }
 0xc4a   : > { %v1660_v17 = vpop.f32.mrf.mxu1  ;;  %1700 = vmatpush.bf16.msrb.mxu3 %v1691_v54 }
 0xc4d   : > { %2151 = vmatmul.msk.bf16.vlgmr.msrb.gmra.mxu3 %vm3412_vm14, %v1686_v58 }
 0xc4f   : > { %1762 = vperm.xlu1 %2255, %v2155_v56   ;;  %1736 = vrot.lane.b32.xlu2 %v1735_v35, %s2426_s19 }
 0xca1   : > { %v1673_v57 = vpop.permute.xlu2 %1672 }
 0xca2   : > { %1675 = vst.msk [vmem:[#allocation2] sm:$0xff] %vm3411_vm13, %v1673_v57 }
 0xca9   : > { %v1676_v60 = vld [vmem:[#allocation2] sm:$0xff]  ;;  %v1737_v15 = vpop.permute.xlu2 %1736 }
 0xcaa   : > { %v1677_v61 = vsel %vm3413_vm15, %v1676_v60, 0.0 }
 0xcab   : > { %v1678_v63 = vpack.c.bf16 %v1677_v61, %v1677_v61 }
 0xcad   : > { %v1710_v0 = vsel %vm3414_vm0, %v1678_v63, 0 }
 0xcae   : > { %1719 = vmatpush.bf16.msra.mxu0 %v1710_v0 }
 0xcb1   : > { %2152 = vmatmul.msk.bf16.vlgmr.msra.gmra.mxu0 %vm3415_vm3, %v2150_v39 }
 0xcb9   : > { %v1726_v1 = vpop.permute.xlu1 %1725 }
 0xcba   : > { %1728 = vst.msk [vmem:[#allocation2] sm:$0xff] %vm3416_vm8, %v1726_v1 }
 0xcc1   : > { %v1729_v4 = vld [vmem:[#allocation2] sm:$0xff]  ;;  %v1763_v21 = vpop.permute.xlu1 %1762 }
 0xcc2   : > { %v1730_v3 = vsel %vm3417_vm2, %v1729_v4, 0.0 }
 0xcc3   : > { %v1731_v6 = vpack.c.bf16 %v1730_v3, %v1730_v3 }
 0xcc5   : > { %v1742_v7 = vsel %vm3418_vm6, %v1731_v6, 0 }
 0xcc6   : > { %1751 = vmatpush.bf16.msra.mxu2 %v1742_v7 }
 0xcc9   : > { %2154 = vmatmul.msk.bf16.vlgmr.msra.gmra.mxu2 %vm3419_vm7, %v1737_v15 }
 0xcd0   : > { %v1702_v8 = vpop.f32.mrf.mxu3 }
 0xcd8   : > { %v1704_v10 = vpop.f32.mrf.mxu3 }
 0xd2e   : > { %v1721_v14 = vpop.f32.mrf.mxu0 }
 0xd2f   : > { %v1722_v19 = vadd.f32 %v1721_v14, %v1702_v8 }
 0xd36   : > { %v1723_v18 = vpop.f32.mrf.mxu0 }
 0xd4c   : > { %v1753_v25 = vpop.f32.mrf.mxu2 }
 0xd4d   : > { %v1757_v20 = vadd.f32 %v1753_v25, %v1722_v19 }
 0xd4f   : > { %v1765_v22 = vadd.f32 %v1763_v21, %v1757_v20 }
 0xd51   : > { %1766 = vst [vmem:[%s2589_s11] sm:$0xff] %v1765_v22 }
 0xd52   : > { %2352 = shalt.err (!%p2349_p1)
}
 0xd53   : > { %2166 = dma.vmem_to_hbm [thread:$0]  (%p2530_p10), %s1787_s27, 128, %s1789_s9, %s1768_s7  }
 0xd54   : > { %v1755_v24 = vpop.f32.mrf.mxu2 }
 0xd55 PF: > { %p2177_p2 = scmp.ge.s32.totalorder %s2423_s25, 2  ;;  %s1804_s11 = sand.u32 1, %s2395_s18  }
 0xd56   : > { %s1805_s12 = scalar_lea.sflag [#allocation5], %s1804_s11 }
 0xd57   : > { %p2173_p4 = pnand %p2177_p2, %p2536_p11 }
 0xd59   : > { %p2174_p3 = pneg %p2173_p4 }
 0xd5b   : > { %2390 = dma.done.wait (%p2174_p3), %s1805_s12, 128  }
 0xd5c   : > { %2392 = vsyncadd (%p2174_p3), %s1805_s12, 4294967168  ;;  %s22_s25 = sadd.s32 1, %s2423_s25   ;;  %s3421_s18 = sld [smem:[#allocation9_spill]] }
 0xd5d   : > { %p19_p5 = scmp.ge.s32.totalorder %s22_s25, 6   ;;  %s3422_s19 = sld [smem:[#allocation10_spill]] }
 0xd5e   : > { %s3423_s20 = sld [smem:[#allocation16_spill]] }
 0xd5f   : > { %s3424_s21 = sld [smem:[#allocation11_spill]]  ;;  %21 = sbr.rel (!%p19_p5) target bundleno = 9 (0x9), region = 128 }
 0xd60   : > { %s3425_s22 = sld [smem:[#allocation12_spill]] }
 0xd61   : > { %s3426_s23 = sld [smem:[#allocation13_spill]] }
 0xd62   : > { %s3427_s24 = sld [smem:[#allocation14_spill]] }
 0xd64   :  { %1820 = vsyncpa [#allocation4], 1 }
 0xd65   :  { %1822 = vsyncpa [#allocation4 + $0x1], 1 }
 0xd66   :  { %1823 = vsyncpa [#allocation5], 1 }
 0xd67   :  { %1825 = vsyncpa [#allocation5 + $0x1], 1 }

</bundles_post_ra>
